<compile_context>
chip_gen: v7x
topology: tpu7x:2x2x1
jax: 0.10.0
libtpu: 0.0.40
codegen_flags: <defaults>
</compile_context>

<pallas_src>
import functools

import jax
import jax.numpy as jnp
from jax.experimental import pallas as pl


# ----------------------------------------------------------------------------
# Fused kernel: encoder convs -> mean/logvar -> reparameterize -> decoder
# Linear -> decoder convs -> output Linear + Sigmoid.  Grid-less; every ref is
# the whole (tiny) array in VMEM.
# ----------------------------------------------------------------------------
def _timevae_kernel(n_enc, n_dec, latent_dim, *refs):
    # refs = (x_flat, eps,
    #         enc_w0, enc_b0, ..., enc_w{n-1}, enc_b{n-1},
    #         ml_w, ml_b, declin_w, declin_b,
    #         dec_w0, dec_b0, ..., dec_w{m-1}, dec_b{m-1},
    #         out_w, out_b,
    #         lat_out_ref, dec_out_ref)
    x_ref, eps_ref = refs[0], refs[1]
    lat_ref, dec_ref = refs[-2], refs[-1]
    pos = 2

    # --- encoder conv chain: one batched banded matmul (+ReLU) per layer ---
    h = x_ref[...]                                            # (B, feat*L)
    for _ in range(n_enc):
        w, b = refs[pos][...], refs[pos + 1][...]
        pos += 2
        h = jnp.maximum(
            jnp.dot(h, w, preferred_element_type=jnp.float32) + b, 0.0)

    # --- mean & log_var: single fused matmul, then reparameterize ---
    ml_w, ml_b = refs[pos][...], refs[pos + 1][...]
    pos += 2
    ml = jnp.dot(h, ml_w, preferred_element_type=jnp.float32) + ml_b  # (B, 2*lat)
    z_mean = ml[:, :latent_dim]
    z_log_var = ml[:, latent_dim:]
    z = z_mean + jnp.exp(0.5 * z_log_var) * eps_ref[...]

    # --- decoder Linear: latent -> hidden[-1]*L (already in conv flat layout)
    dw, db = refs[pos][...], refs[pos + 1][...]
    pos += 2
    d = jnp.dot(z, dw, preferred_element_type=jnp.float32) + db       # (B, F)

    # --- decoder ConvTranspose chain (folded to conv band matrices at init)
    for _ in range(n_dec):
        w, b = refs[pos][...], refs[pos + 1][...]
        pos += 2
        d = jnp.maximum(
            jnp.dot(d, w, preferred_element_type=jnp.float32) + b, 0.0)

    # --- output Linear + Sigmoid (EUP exp + approx reciprocal) ---
    ow, ob = refs[pos][...], refs[pos + 1][...]
    y = jnp.dot(d, ow, preferred_element_type=jnp.float32) + ob       # (B, feat*L)
    sig = pl.reciprocal(1.0 + jnp.exp(-y), approx=True)

    # Consolidated latent slab [z | z_log_var | z_mean]; split in the wrapper.
    lat_ref[...] = jnp.concatenate([z, z_log_var, z_mean], axis=1).astype(
        lat_ref.dtype)
    dec_ref[...] = sig.astype(dec_ref.dtype)


# ----------------------------------------------------------------------------
# Forward wrapper: one pallas_call, plus free contiguous reshapes / static
# slices (layout plumbing only, no compute).
# ----------------------------------------------------------------------------
def timevae_forward(params, x, eps, *, seq_len, feat_dim, latent_dim):
    B = x.shape[0]
    n_enc = len(params["enc_w"])
    n_dec = len(params["dec_w"])
    nf = feat_dim * seq_len

    x_flat = x.reshape(B, nf)   # contiguous (B, C, L) flatten == torch.Flatten

    args = [x_flat, eps]
    for w, b in zip(params["enc_w"], params["enc_b"]):
        args += [w, b]
    args += [params["ml_w"], params["ml_b"],
             params["declin_w"], params["declin_b"]]
    for w, b in zip(params["dec_w"], params["dec_b"]):
        args += [w, b]
    args += [params["out_w"], params["out_b"]]

    lat, dec_flat = pl.pallas_call(
        functools.partial(_timevae_kernel, n_enc, n_dec, latent_dim),
        out_shape=(
            jax.ShapeDtypeStruct((B, 3 * latent_dim), x.dtype),  # [z|logvar|mean]
            jax.ShapeDtypeStruct((B, nf), x.dtype),              # sigmoid output
        ),
    )(*args)

    encoder_output = lat[:, :latent_dim]
    z_log_var = lat[:, latent_dim:2 * latent_dim]
    z_mean = lat[:, 2 * latent_dim:]
    decoder_output = dec_flat.reshape(B, feat_dim, seq_len)
    return encoder_output, decoder_output, z_log_var, z_mean


# ----------------------------------------------------------------------------
# Parameter construction (deterministic, synthetic — no checkpoint load).
# All layout work (conv -> banded matrix fold, ConvTranspose -> Conv
# conversion, mean/logvar fusion, bias flattening) happens ONCE here.
# ----------------------------------------------------------------------------
def _uniform(key, shape, fan_in):
    bound = 1.0 / jnp.sqrt(jnp.asarray(fan_in, jnp.float32))
    return jax.random.uniform(key, shape, jnp.float32, -bound, bound)


def _conv_band(w, length):
    """Fold a k-tap 'same' Conv1d weight (C_out, C_in, K) into a banded matrix
    W (C_in*L, C_out*L) such that  y_flat = x_flat @ W  equals the conv, with
    x_flat[b, ci*L + j] / y_flat[b, co*L + l] using torch's contiguous
    (B, C, L) flatten order.  'same' zero padding is encoded by the zeros of
    the band."""
    c_out, c_in, k = w.shape
    j = jnp.arange(length)[:, None]          # input position
    l = jnp.arange(length)[None, :]          # output position
    t = j - l + (k // 2)                     # tap index (odd k, pad = k//2)
    valid = (t >= 0) & (t < k)
    taps = jnp.clip(t, 0, k - 1)             # (L, L)
    band = w[:, :, taps]                     # (C_out, C_in, L, L)
    band = jnp.where(valid[None, None, :, :], band, 0.0)
    band = jnp.transpose(band, (1, 2, 0, 3)).reshape(c_in * length,
                                                     c_out * length)
    return band


def _flat_bias(b, length):
    """(C_out,) conv bias -> (1, C_out*L) bias for the flat layout."""
    return jnp.repeat(b, length)[None, :]


def init_timevae_params(key, seq_len, feat_dim, latent_dim, hidden):
    keys = iter(jax.random.split(key, 64))
    p = {}
    L = seq_len

    # Encoder: Conv1d(in=c_prev, out=h, k=3, padding='same') -> band matrix.
    c_prev = feat_dim
    p["enc_w"], p["enc_b"] = [], []
    for h in hidden:
        fan_in = c_prev * 3
        w = _uniform(next(keys), (h, c_prev, 3), fan_in)
        b = _uniform(next(keys), (h,), fan_in)
        p["enc_w"].append(_conv_band(w, L))
        p["enc_b"].append(_flat_bias(b, L))
        c_prev = h

    F = hidden[-1] * L

    # mean / log_var fused into a single (F, 2*latent) matmul (x @ W layout).
    mean_w = _uniform(next(keys), (F, latent_dim), F)
    mean_b = _uniform(next(keys), (latent_dim,), F)
    logvar_w = _uniform(next(keys), (F, latent_dim), F)
    logvar_b = _uniform(next(keys), (latent_dim,), F)
    p["ml_w"] = jnp.concatenate([mean_w, logvar_w], axis=1)
    p["ml_b"] = jnp.concatenate([mean_b, logvar_b])[None, :]

    # linear_decoder: latent -> F (output already in conv flat layout).
    p["declin_w"] = _uniform(next(keys), (latent_dim, F), latent_dim)
    p["declin_b"] = _uniform(next(keys), (F,), latent_dim)[None, :]

    # Decoder ConvTranspose1d(Cin, Cout, k=3, s=1, p=1) == Conv1d 'same' with
    # w_conv[co, ci, t] = w_t[ci, co, 2 - t]; converted, then folded to bands.
    out_channels = list(reversed(hidden))[:-1] + [feat_dim]
    c_prev = hidden[-1]
    p["dec_w"], p["dec_b"] = [], []
    for c_out in out_channels:
        fan_in = c_prev * 3
        w_t = _uniform(next(keys), (c_prev, c_out, 3), fan_in)   # (Cin, Cout, K)
        b = _uniform(next(keys), (c_out,), fan_in)
        w_conv = jnp.flip(jnp.transpose(w_t, (1, 0, 2)), axis=-1)  # (Cout, Cin, K)
        p["dec_w"].append(_conv_band(w_conv, L))
        p["dec_b"].append(_flat_bias(b, L))
        c_prev = c_out

    # decoder_output: Linear(feat*L -> feat*L) + Sigmoid.
    # NOTE (v7x): out_w is the only quadratically-scaling buffer ((feat*L)^2);
    # around feat*L ~ 2.8K it would need column tiling under v7x's smaller
    # VMEM.  At 64x64 f32 (16 KiB) it is a non-issue on all generations.
    nf = feat_dim * L
    p["out_w"] = _uniform(next(keys), (nf, nf), nf)
    p["out_b"] = _uniform(next(keys), (nf,), nf)[None, :]
    return p


# ----------------------------------------------------------------------------
if __name__ == "__main__":
    SEQ_LEN = 16
    FEAT_DIM = 4
    LATENT_DIM = 8
    HIDDEN = [16, 32]
    BATCH = 2

    key = jax.random.PRNGKey(0)
    k_params, k_x, k_eps = jax.random.split(key, 3)

    params = init_timevae_params(k_params, SEQ_LEN, FEAT_DIM, LATENT_DIM, HIDDEN)
    x = jax.random.normal(k_x, (BATCH, FEAT_DIM, SEQ_LEN), jnp.float32)
    eps = jax.random.normal(k_eps, (BATCH, LATENT_DIM), jnp.float32)

    fwd = jax.jit(functools.partial(
        timevae_forward, seq_len=SEQ_LEN, feat_dim=FEAT_DIM,
        latent_dim=LATENT_DIM))
    enc_out, dec_out, z_log_var, z_mean = fwd(params, x, eps)
    jax.block_until_ready((enc_out, dec_out, z_log_var, z_mean))

    assert enc_out.shape == (BATCH, LATENT_DIM)
    assert dec_out.shape == (BATCH, FEAT_DIM, SEQ_LEN)
    assert z_log_var.shape == (BATCH, LATENT_DIM)
    assert z_mean.shape == (BATCH, LATENT_DIM)
    assert bool(jnp.all(jnp.isfinite(dec_out)))
    assert bool(jnp.all(jnp.isfinite(enc_out)))
    # Sigmoid via approx (EUP) reciprocal: allow ~1e-3 slack at the bounds.
    assert bool(jnp.all((dec_out >= -1e-3) & (dec_out <= 1.0 + 1e-3)))
    print("KERNEL_OK")
</pallas_src>

<mosaic_0001>
module attributes {stable_mosaic.version = 11 : i64} {
  func.func @_timevae_kernel(%arg0: memref<2x64xf32, #tpu.memory_space<vmem>>, %arg1: memref<2x8xf32, #tpu.memory_space<vmem>>, %arg2: memref<64x256xf32, #tpu.memory_space<vmem>>, %arg3: memref<1x256xf32, #tpu.memory_space<vmem>>, %arg4: memref<256x512xf32, #tpu.memory_space<vmem>>, %arg5: memref<1x512xf32, #tpu.memory_space<vmem>>, %arg6: memref<512x16xf32, #tpu.memory_space<vmem>>, %arg7: memref<1x16xf32, #tpu.memory_space<vmem>>, %arg8: memref<8x512xf32, #tpu.memory_space<vmem>>, %arg9: memref<1x512xf32, #tpu.memory_space<vmem>>, %arg10: memref<512x512xf32, #tpu.memory_space<vmem>>, %arg11: memref<1x512xf32, #tpu.memory_space<vmem>>, %arg12: memref<512x64xf32, #tpu.memory_space<vmem>>, %arg13: memref<1x64xf32, #tpu.memory_space<vmem>>, %arg14: memref<64x64xf32, #tpu.memory_space<vmem>>, %arg15: memref<1x64xf32, #tpu.memory_space<vmem>>, %arg16: memref<2x24xf32, #tpu.memory_space<vmem>>, %arg17: memref<2x64xf32, #tpu.memory_space<vmem>>) attributes {dimension_semantics = [], scalar_prefetch = 0 : i64, scratch_operands = 0 : i64, tpu.core_type = #tpu.core_type<tc>} {
    %c0 = arith.constant 0 : index
    %c0_0 = arith.constant 0 : index
    %0 = vector.load %arg0[%c0, %c0_0] : memref<2x64xf32, #tpu.memory_space<vmem>>, vector<2x64xf32>
    %c0_1 = arith.constant 0 : index
    %c0_2 = arith.constant 0 : index
    %1 = vector.load %arg2[%c0_1, %c0_2] : memref<64x256xf32, #tpu.memory_space<vmem>>, vector<64x256xf32>
    %c0_3 = arith.constant 0 : index
    %c0_4 = arith.constant 0 : index
    %2 = vector.load %arg3[%c0_3, %c0_4] : memref<1x256xf32, #tpu.memory_space<vmem>>, vector<1x256xf32>
    %cst = arith.constant dense<0.000000e+00> : vector<2x256xf32>
    %3 = tpu.matmul %0, %1, %cst {dimension_numbers = #tpu.dot_dimension_numbers<[1], [0], [0], [1], [0, 0, 1, 1], [], []>} : vector<2x64xf32>, vector<64x256xf32>, vector<2x256xf32> -> vector<2x256xf32>
    %4 = vector.broadcast %2 : vector<1x256xf32> to vector<2x256xf32>
    %5 = arith.addf %3, %4 : vector<2x256xf32>
    %cst_5 = arith.constant 0.000000e+00 : f32
    %6 = vector.broadcast %cst_5 : f32 to vector<2x256xf32>
    %7 = arith.maximumf %5, %6 : vector<2x256xf32>
    %c0_6 = arith.constant 0 : index
    %c0_7 = arith.constant 0 : index
    %8 = vector.load %arg4[%c0_6, %c0_7] : memref<256x512xf32, #tpu.memory_space<vmem>>, vector<256x512xf32>
    %c0_8 = arith.constant 0 : index
    %c0_9 = arith.constant 0 : index
    %9 = vector.load %arg5[%c0_8, %c0_9] : memref<1x512xf32, #tpu.memory_space<vmem>>, vector<1x512xf32>
    %cst_10 = arith.constant dense<0.000000e+00> : vector<2x512xf32>
    %10 = tpu.matmul %7, %8, %cst_10 {dimension_numbers = #tpu.dot_dimension_numbers<[1], [0], [0], [1], [0, 0, 1, 1], [], []>} : vector<2x256xf32>, vector<256x512xf32>, vector<2x512xf32> -> vector<2x512xf32>
    %11 = vector.broadcast %9 : vector<1x512xf32> to vector<2x512xf32>
    %12 = arith.addf %10, %11 : vector<2x512xf32>
    %cst_11 = arith.constant 0.000000e+00 : f32
    %13 = vector.broadcast %cst_11 : f32 to vector<2x512xf32>
    %14 = arith.maximumf %12, %13 : vector<2x512xf32>
    %c0_12 = arith.constant 0 : index
    %c0_13 = arith.constant 0 : index
    %15 = vector.load %arg6[%c0_12, %c0_13] : memref<512x16xf32, #tpu.memory_space<vmem>>, vector<512x16xf32>
    %c0_14 = arith.constant 0 : index
    %c0_15 = arith.constant 0 : index
    %16 = vector.load %arg7[%c0_14, %c0_15] : memref<1x16xf32, #tpu.memory_space<vmem>>, vector<1x16xf32>
    %cst_16 = arith.constant dense<0.000000e+00> : vector<2x16xf32>
    %17 = tpu.matmul %14, %15, %cst_16 {dimension_numbers = #tpu.dot_dimension_numbers<[1], [0], [0], [1], [0, 0, 1, 1], [], []>} : vector<2x512xf32>, vector<512x16xf32>, vector<2x16xf32> -> vector<2x16xf32>
    %18 = vector.broadcast %16 : vector<1x16xf32> to vector<2x16xf32>
    %19 = arith.addf %17, %18 : vector<2x16xf32>
    %20 = vector.extract_strided_slice %19 {offsets = [0, 0], sizes = [2, 8], strides = [1, 1]} : vector<2x16xf32> to vector<2x8xf32>
    %21 = vector.extract_strided_slice %19 {offsets = [0, 8], sizes = [2, 8], strides = [1, 1]} : vector<2x16xf32> to vector<2x8xf32>
    %cst_17 = arith.constant 5.000000e-01 : f32
    %22 = vector.broadcast %cst_17 : f32 to vector<2x8xf32>
    %23 = arith.mulf %22, %21 : vector<2x8xf32>
    %24 = math.exp %23 : vector<2x8xf32>
    %c0_18 = arith.constant 0 : index
    %c0_19 = arith.constant 0 : index
    %25 = vector.load %arg1[%c0_18, %c0_19] : memref<2x8xf32, #tpu.memory_space<vmem>>, vector<2x8xf32>
    %26 = arith.mulf %24, %25 : vector<2x8xf32>
    %27 = arith.addf %20, %26 : vector<2x8xf32>
    %c0_20 = arith.constant 0 : index
    %c0_21 = arith.constant 0 : index
    %28 = vector.load %arg8[%c0_20, %c0_21] : memref<8x512xf32, #tpu.memory_space<vmem>>, vector<8x512xf32>
    %c0_22 = arith.constant 0 : index
    %c0_23 = arith.constant 0 : index
    %29 = vector.load %arg9[%c0_22, %c0_23] : memref<1x512xf32, #tpu.memory_space<vmem>>, vector<1x512xf32>
    %cst_24 = arith.constant dense<0.000000e+00> : vector<2x512xf32>
    %30 = tpu.matmul %27, %28, %cst_24 {dimension_numbers = #tpu.dot_dimension_numbers<[1], [0], [0], [1], [0, 0, 1, 1], [], []>} : vector<2x8xf32>, vector<8x512xf32>, vector<2x512xf32> -> vector<2x512xf32>
    %31 = vector.broadcast %29 : vector<1x512xf32> to vector<2x512xf32>
    %32 = arith.addf %30, %31 : vector<2x512xf32>
    %c0_25 = arith.constant 0 : index
    %c0_26 = arith.constant 0 : index
    %33 = vector.load %arg10[%c0_25, %c0_26] : memref<512x512xf32, #tpu.memory_space<vmem>>, vector<512x512xf32>
    %c0_27 = arith.constant 0 : index
    %c0_28 = arith.constant 0 : index
    %34 = vector.load %arg11[%c0_27, %c0_28] : memref<1x512xf32, #tpu.memory_space<vmem>>, vector<1x512xf32>
    %cst_29 = arith.constant dense<0.000000e+00> : vector<2x512xf32>
    %35 = tpu.matmul %32, %33, %cst_29 {dimension_numbers = #tpu.dot_dimension_numbers<[1], [0], [0], [1], [0, 0, 1, 1], [], []>} : vector<2x512xf32>, vector<512x512xf32>, vector<2x512xf32> -> vector<2x512xf32>
    %36 = vector.broadcast %34 : vector<1x512xf32> to vector<2x512xf32>
    %37 = arith.addf %35, %36 : vector<2x512xf32>
    %cst_30 = arith.constant 0.000000e+00 : f32
    %38 = vector.broadcast %cst_30 : f32 to vector<2x512xf32>
    %39 = arith.maximumf %37, %38 : vector<2x512xf32>
    %c0_31 = arith.constant 0 : index
    %c0_32 = arith.constant 0 : index
    %40 = vector.load %arg12[%c0_31, %c0_32] : memref<512x64xf32, #tpu.memory_space<vmem>>, vector<512x64xf32>
    %c0_33 = arith.constant 0 : index
    %c0_34 = arith.constant 0 : index
    %41 = vector.load %arg13[%c0_33, %c0_34] : memref<1x64xf32, #tpu.memory_space<vmem>>, vector<1x64xf32>
    %cst_35 = arith.constant dense<0.000000e+00> : vector<2x64xf32>
    %42 = tpu.matmul %39, %40, %cst_35 {dimension_numbers = #tpu.dot_dimension_numbers<[1], [0], [0], [1], [0, 0, 1, 1], [], []>} : vector<2x512xf32>, vector<512x64xf32>, vector<2x64xf32> -> vector<2x64xf32>
    %43 = vector.broadcast %41 : vector<1x64xf32> to vector<2x64xf32>
    %44 = arith.addf %42, %43 : vector<2x64xf32>
    %cst_36 = arith.constant 0.000000e+00 : f32
    %45 = vector.broadcast %cst_36 : f32 to vector<2x64xf32>
    %46 = arith.maximumf %44, %45 : vector<2x64xf32>
    %c0_37 = arith.constant 0 : index
    %c0_38 = arith.constant 0 : index
    %47 = vector.load %arg14[%c0_37, %c0_38] : memref<64x64xf32, #tpu.memory_space<vmem>>, vector<64x64xf32>
    %c0_39 = arith.constant 0 : index
    %c0_40 = arith.constant 0 : index
    %48 = vector.load %arg15[%c0_39, %c0_40] : memref<1x64xf32, #tpu.memory_space<vmem>>, vector<1x64xf32>
    %cst_41 = arith.constant dense<0.000000e+00> : vector<2x64xf32>
    %49 = tpu.matmul %46, %47, %cst_41 {dimension_numbers = #tpu.dot_dimension_numbers<[1], [0], [0], [1], [0, 0, 1, 1], [], []>} : vector<2x64xf32>, vector<64x64xf32>, vector<2x64xf32> -> vector<2x64xf32>
    %50 = vector.broadcast %48 : vector<1x64xf32> to vector<2x64xf32>
    %51 = arith.addf %49, %50 : vector<2x64xf32>
    %cst_42 = arith.constant 0.000000e+00 : f32
    %52 = vector.broadcast %cst_42 : f32 to vector<2x64xf32>
    %53 = arith.subf %52, %51 : vector<2x64xf32>
    %54 = math.exp %53 : vector<2x64xf32>
    %cst_43 = arith.constant 1.000000e+00 : f32
    %55 = vector.broadcast %cst_43 : f32 to vector<2x64xf32>
    %56 = arith.addf %55, %54 : vector<2x64xf32>
    %57 = tpu.reciprocal %56 {approx = true} : vector<2x64xf32> -> vector<2x64xf32>
    %58 = tpu.concatenate %27, %21, %20 in 1 : vector<2x8xf32>, vector<2x8xf32>, vector<2x8xf32> -> vector<2x24xf32>
    %c0_44 = arith.constant 0 : index
    %c0_45 = arith.constant 0 : index
    %59 = vector.load %arg16[%c0_44, %c0_45] : memref<2x24xf32, #tpu.memory_space<vmem>>, vector<2x24xf32>
    tpu.vector_store %arg16[%c0_44, %c0_45], %58 {strides = array<i32>} : memref<2x24xf32, #tpu.memory_space<vmem>>, vector<2x24xf32>,
    %c0_46 = arith.constant 0 : index
    %c0_47 = arith.constant 0 : index
    %60 = vector.load %arg17[%c0_46, %c0_47] : memref<2x64xf32, #tpu.memory_space<vmem>>, vector<2x64xf32>
    tpu.vector_store %arg17[%c0_46, %c0_47], %57 {strides = array<i32>} : memref<2x64xf32, #tpu.memory_space<vmem>>, vector<2x64xf32>,
    return
  }
}

</mosaic_0001>

<bundles_post_ra>
// kernel: timevae_forward.1
= control target key start
LH: loop header
LB: loop body
LE: loop exit
PB: predicated region body
PF: predicated region fallthrough
CT: control target
= control target key end

     0   :  { %s3563_s0 = inlined_call_operand.vmem [shape: f32[2,64], index: 0, kind: input, shape index: {}]   ;;  %s3564_s1 = inlined_call_operand.vmem [shape: f32[2,8], index: 1, kind: input, shape index: {}]   ;;  %s3565_s2 = inlined_call_operand.vmem [shape: f32[64,256], index: 2, kind: input, shape index: {}]   ;;  %s3566_s3 = inlined_call_operand.vmem [shape: f32[1,256], index: 3, kind: input, shape index: {}]   ;;  %s3567_s4 = inlined_call_operand.vmem [shape: f32[256,512], index: 4, kind: input, shape index: {}]   ;;  %s3568_s5 = inlined_call_operand.vmem [shape: f32[1,512], index: 5, kind: input, shape index: {}]   ;;  %s3569_s6 = inlined_call_operand.vmem [shape: f32[512,16], index: 6, kind: input, shape index: {}]   ;;  %s3570_s7 = inlined_call_operand.vmem [shape: f32[1,16], index: 7, kind: input, shape index: {}]   ;;  %s3571_s8 = inlined_call_operand.vmem [shape: f32[8,512], index: 8, kind: input, shape index: {}]   ;;  %s3572_s9 = inlined_call_operand.vmem [shape: f32[1,512], index: 9, kind: input, shape index: {}]   ;;  %s3573_s10 = inlined_call_operand.hbm [shape: f32[512,512], index: 10, kind: input, shape index: {}]   ;;  %s3574_s11 = inlined_call_operand.vmem [shape: f32[1,512], index: 11, kind: input, shape index: {}]   ;;  %s3575_s12 = inlined_call_operand.vmem [shape: f32[512,64], index: 12, kind: input, shape index: {}]   ;;  %s3576_s13 = inlined_call_operand.vmem [shape: f32[1,64], index: 13, kind: input, shape index: {}]   ;;  %s3577_s14 = inlined_call_operand.vmem [shape: f32[64,64], index: 14, kind: input, shape index: {}]   ;;  %s3578_s15 = inlined_call_operand.vmem [shape: f32[1,64], index: 15, kind: input, shape index: {}]   ;;  %s3579_s16 = inlined_call_operand.vmem [shape: f32[2,24], index: 16, kind: output, shape index: {0}]   ;;  %s3580_s17 = inlined_call_operand.vmem [shape: f32[2,64], index: 17, kind: output, shape index: {1}]  }
   0x1   :  { %3581 = sst [smem:[#allocation5_spill]] %s3563_s0 }
   0x2   :  { %3582 = sst [smem:[#allocation6_spill]] %s3564_s1 }
   0x3   :  { %23 = vsyncpa [#allocation3], 0  ;;  %s2521_s24 = smov [#allocation2]   ;;  %s2497_s28 = scalar_lea.hbm %s3573_s10, 32768 }
   0x4   :  { %s49_s25 = sshll.u32 %s2521_s24, 4  ;;  %p2498_p0 = scmp.ne.s32.totalorder %s3573_s10, %s2497_s28  ;;  %s50_s25 = int_to_ptr.vmem [resolvable:$true] %s49_s25 }
   0x5   :  { %p2501_p1 = scmp.lt.u32.totalorder %s2497_s28, %s3573_s10 }
   0x7   :  { %p2503_p2 = pnand %p2501_p1, %p2498_p0 }
   0x9   :  { %2506 = shalt.err (!%p2503_p2)
}
   0xa   :  { %s2507_s19 = scalar_lea.vmem %s50_s25, 32768  ;;  %p2512_p4 = scmp.lt.s32.totalorder %s50_s25, %s50_s25 }
   0xb   :  { %p2508_p3 = scmp.ne.s32.totalorder %s50_s25, %s2507_s19  ;;  %p2513_p5 = scmp.lt.s32.totalorder %s2507_s19, %s2507_s19 }
   0xd   :  { %p2514_p6 = por %p2513_p5, %p2512_p4 }
   0xf   :  { %p2515_p7 = pnand %p2514_p6, %p2508_p3 }
  0x11   :  { %2518 = shalt.err (!%p2515_p7)
}
  0x12   :  { %s2522_s1 = smov 512   ;;  %s2523_s20 = smov 32  }
  0x13   :  { %55 = dma.hbm_to_vmem [thread:$0]  %s3573_s10, 32768, %s50_s25, [#allocation3], %s2522_s1, %s2522_s1, %s2523_s20  }
  0x14   :  { %2519 = dma.done.wait [#allocation3], 32768  }
  0x15   :  { %2520 = vsyncadd [#allocation3], 4294934528  ;;  %v2524_v0 = vmov 0.0   ;;  %v71_v1 = vld [vmem:[%s3565_s2 + $0x8] sm:$0xff]  ;;  %v73_v2 = vld [vmem:[%s3565_s2 + $0x18] sm:$0xff]  ;;  %s3583_s1 = sld [smem:[#allocation5_spill]] }
  0x16   :  { %166 = vmatprep.mubr.f32.mxu0 %v2524_v0  ;;  %v70_v3 = vld [vmem:[%s3565_s2] sm:$0xff]  ;;  %v1934_v4 = vpack.c.bf16 %v73_v2, %v71_v1  ;;  %v72_v5 = vld [vmem:[%s3565_s2 + $0x10] sm:$0xff]  ;;  %v75_v6 = vld [vmem:[%s3565_s2 + $0x28] sm:$0xff]  ;;  %vm98_vm0 = vcmask 523264   ;;  %s2525_s28 = smov 8   ;;  %vm722_vm1 = vcmask 64512  }
  0x17   :  { %v77_v7 = vld [vmem:[%s3565_s2 + $0x38] sm:$0xff]  ;;  %v1936_v8 = vpack.c.bf16 %v72_v5, %v70_v3  ;;  %v74_v10 = vld [vmem:[%s3565_s2 + $0x20] sm:$0xff]  ;;  %v76_v11 = vld [vmem:[%s3565_s2 + $0x30] sm:$0xff]  ;;  %vm1744_vm2 = vcmask 130048   ;;  %vm1746_vm3 = vcmask 189440   ;;  %vm2529_vm4 = vmmov 0  }
  0x18   :  { %v1938_v9 = vpack.c.bf16 %v77_v7, %v75_v6  ;;  %v79_v12 = vld [vmem:[%s3565_s2 + $0x48] sm:$0xff]  ;;  %1935 = vmatprep.subr.bf16.mxu0 %v1934_v4  ;;  %v81_v13 = vld [vmem:[%s3565_s2 + $0x58] sm:$0xff]  ;;  %v1940_v14 = vpack.c.bf16 %v76_v11, %v74_v10  ;;  %v78_v16 = vld [vmem:[%s3565_s2 + $0x40] sm:$0xff]  ;;  %vm1748_vm5 = vcmask 517120  }
  0x19   :  { %1937 = vmatpush1.bf16.msra.mxu0 %v1936_v8  ;;  %v1942_v15 = vpack.c.bf16 %v81_v13, %v79_v12  ;;  %v80_v17 = vld [vmem:[%s3565_s2 + $0x50] sm:$0xff]  ;;  %v176_v18 = vld [vmem:[%s3567_s4 + $0x8] sm:$0xff]  ;;  %v85_v20 = vld [vmem:[%s3565_s2 + $0x78] sm:$0xff] }
  0x1a   :  { %1939 = vmatprep.subr.bf16.mxu0 %v1938_v9  ;;  %v83_v19 = vld [vmem:[%s3565_s2 + $0x68] sm:$0xff]  ;;  %v175_v23 = vld [vmem:[%s3567_s4] sm:$0xff]  ;;  %v1944_v25 = vpack.c.bf16 %v80_v17, %v78_v16  ;;  %v84_v31 = vld [vmem:[%s3565_s2 + $0x70] sm:$0xff] }
  0x1b   :  { %v180_v21 = vld [vmem:[%s3567_s4 + $0x28] sm:$0xff]  ;;  %v179_v24 = vld [vmem:[%s3567_s4 + $0x20] sm:$0xff]  ;;  %v1946_v29 = vpack.c.bf16 %v85_v20, %v83_v19  ;;  %v178_v34 = vld [vmem:[%s3567_s4 + $0x18] sm:$0xff] }
  0x1c   :  { %v1950_v22 = vpack.c.bf16 %v180_v21, %v176_v18  ;;  %v1952_v26 = vpack.c.bf16 %v179_v24, %v175_v23  ;;  %v184_v27 = vld [vmem:[%s3567_s4 + $0x48] sm:$0xff]  ;;  %v82_v30 = vld [vmem:[%s3565_s2 + $0x60] sm:$0xff]  ;;  %v182_v35 = vld [vmem:[%s3567_s4 + $0x38] sm:$0xff]  ;;  %s3584_s2 = sld [smem:[#allocation6_spill]] }
  0x1d   :  { %1941 = vmatpush1.bf16.msra.mxu0 %v1940_v14  ;;  %v188_v28 = vld [vmem:[%s3567_s4 + $0x68] sm:$0xff]  ;;  %v183_v33 = vld [vmem:[%s3567_s4 + $0x40] sm:$0xff]  ;;  %v1948_v40 = vpack.c.bf16 %v84_v31, %v82_v30  ;;  %v2014_v44 = vpack.c.bf16 %v182_v35, %v178_v34  ;;  %v177_v45 = vld [vmem:[%s3567_s4 + $0x10] sm:$0xff] }
  0x1e   :  { %1943 = vmatprep.subr.bf16.mxu0 %v1942_v15  ;;  %1951 = vmatprep.subr.bf16.mxu1 %v1950_v22  ;;  %v1954_v32 = vpack.c.bf16 %v188_v28, %v184_v27  ;;  %v187_v36 = vld [vmem:[%s3567_s4 + $0x60] sm:$0xff]  ;;  %v192_v38 = vld [vmem:[%s3567_s4 + $0x88] sm:$0xff]  ;;  %v181_v46 = vld [vmem:[%s3567_s4 + $0x30] sm:$0xff] }
  0x1f   :  { %1953 = vmatpush1.bf16.msra.mxu1 %v1952_v26  ;;  %v1956_v37 = vpack.c.bf16 %v187_v36, %v183_v33  ;;  %v196_v39 = vld [vmem:[%s3567_s4 + $0xa8] sm:$0xff]  ;;  %v191_v42 = vld [vmem:[%s3567_s4 + $0x80] sm:$0xff]  ;;  %v186_v48 = vld [vmem:[%s3567_s4 + $0x58] sm:$0xff]  ;;  %v2016_v56 = vpack.c.bf16 %v181_v46, %v177_v45 }
  0x20   :  { %1955 = vmatprep.subr.bf16.mxu1 %v1954_v32  ;;  %v1958_v41 = vpack.c.bf16 %v196_v39, %v192_v38  ;;  %v195_v43 = vld [vmem:[%s3567_s4 + $0xa0] sm:$0xff]  ;;  %v200_v47 = vld [vmem:[%s3567_s4 + $0xc8] sm:$0xff]  ;;  %v190_v49 = vld [vmem:[%s3567_s4 + $0x78] sm:$0xff] }
  0x21   :  { %1945 = vmatpush1.bf16.msra.mxu0 %v1944_v25  ;;  %v1960_v50 = vpack.c.bf16 %v195_v43, %v191_v42  ;;  %v204_v51 = vld [vmem:[%s3567_s4 + $0xe8] sm:$0xff]  ;;  %v199_v53 = vld [vmem:[%s3567_s4 + $0xc0] sm:$0xff]  ;;  %v2018_v59 = vpack.c.bf16 %v190_v49, %v186_v48  ;;  %v185_v60 = vld [vmem:[%s3567_s4 + $0x50] sm:$0xff] }
  0x22   :  { %1947 = vmatprep.subr.bf16.mxu0 %v1946_v29  ;;  %v1962_v52 = vpack.c.bf16 %v204_v51, %v200_v47  ;;  %v203_v54 = vld [vmem:[%s3567_s4 + $0xe0] sm:$0xff]  ;;  %v208_v57 = vld [vmem:[%s3567_s4 + $0x108] sm:$0xff]  ;;  %v189_v61 = vld [vmem:[%s3567_s4 + $0x70] sm:$0xff] }
  0x23   :  { %1957 = vmatpush1.bf16.msra.mxu1 %v1956_v37  ;;  %v69_v55 = vld [vmem:[%s3583_s1] sm:$0x3]  ;;  %v212_v58 = vld [vmem:[%s3567_s4 + $0x128] sm:$0xff]  ;;  %v194_v62 = vld [vmem:[%s3567_s4 + $0x98] sm:$0xff]  ;;  %v1964_v1 = vpack.c.bf16 %v203_v54, %v199_v53  ;;  %v2020_v5 = vpack.c.bf16 %v189_v61, %v185_v60 }
  0x24   :  { %1959 = vmatprep.subr.bf16.mxu1 %v1958_v41  ;;  %v198_v63 = vld [vmem:[%s3567_s4 + $0xb8] sm:$0xff]  ;;  %v1966_v2 = vpack.c.bf16 %v212_v58, %v208_v57  ;;  %v207_v3 = vld [vmem:[%s3567_s4 + $0x100] sm:$0xff]  ;;  %v216_v6 = vld [vmem:[%s3567_s4 + $0x148] sm:$0xff] }
  0x25   :  { %1949 = vmatpush1.bf16.msra.mxu0 %v1948_v40  ;;  %v211_v4 = vld [vmem:[%s3567_s4 + $0x120] sm:$0xff]  ;;  %v220_v7 = vld [vmem:[%s3567_s4 + $0x168] sm:$0xff]  ;;  %v2022_v8 = vpack.c.bf16 %v198_v63, %v194_v62  ;;  %v193_v9 = vld [vmem:[%s3567_s4 + $0x90] sm:$0xff] }
  0x26   :  { %2015 = vmatprep.subr.bf16.mxu0 %v2014_v44  ;;  %v197_v10 = vld [vmem:[%s3567_s4 + $0xb0] sm:$0xff]  ;;  %v202_v11 = vld [vmem:[%s3567_s4 + $0xd8] sm:$0xff]  ;;  %v1968_v13 = vpack.c.bf16 %v211_v4, %v207_v3  ;;  %v1970_v14 = vpack.c.bf16 %v220_v7, %v216_v6  ;;  %v215_v15 = vld [vmem:[%s3567_s4 + $0x140] sm:$0xff] }
  0x27   :  { %1961 = vmatpush1.bf16.msra.mxu1 %v1960_v50  ;;  %v206_v12 = vld [vmem:[%s3567_s4 + $0xf8] sm:$0xff]  ;;  %v219_v16 = vld [vmem:[%s3567_s4 + $0x160] sm:$0xff]  ;;  %v2024_v17 = vpack.c.bf16 %v197_v10, %v193_v9  ;;  %v224_v18 = vld [vmem:[%s3567_s4 + $0x188] sm:$0xff] }
  0x28   :  { %1759 = vmatmul.mubr.msk.f32.vlgmr.msra.gmra.mrb[0].mxu0 %vm98_vm0, %v69_v55  ;;  %1963 = vmatprep.subr.bf16.mxu1 %v1962_v52  ;;  %v228_v19 = vld [vmem:[%s3567_s4 + $0x1a8] sm:$0xff]  ;;  %v2026_v20 = vpack.c.bf16 %v206_v12, %v202_v11  ;;  %v201_v21 = vld [vmem:[%s3567_s4 + $0xd0] sm:$0xff]  ;;  %v210_v23 = vld [vmem:[%s3567_s4 + $0x118] sm:$0xff]  ;;  %v1972_v25 = vpack.c.bf16 %v219_v16, %v215_v15 }
  0x29   :  { %2017 = vmatpush1.bf16.msra.mxu0 %v2016_v56  ;;  %v205_v22 = vld [vmem:[%s3567_s4 + $0xf0] sm:$0xff]  ;;  %v214_v24 = vld [vmem:[%s3567_s4 + $0x138] sm:$0xff]  ;;  %v1974_v26 = vpack.c.bf16 %v228_v19, %v224_v18  ;;  %v223_v27 = vld [vmem:[%s3567_s4 + $0x180] sm:$0xff] }
  0x2a   :  { %2019 = vmatprep.subr.bf16.mxu0 %v2018_v59  ;;  %v227_v28 = vld [vmem:[%s3567_s4 + $0x1a0] sm:$0xff]  ;;  %v2028_v29 = vpack.c.bf16 %v205_v22, %v201_v21  ;;  %v232_v30 = vld [vmem:[%s3567_s4 + $0x1c8] sm:$0xff]  ;;  %v2030_v32 = vpack.c.bf16 %v214_v24, %v210_v23  ;;  %v209_v33 = vld [vmem:[%s3567_s4 + $0x110] sm:$0xff] }
  0x2b   :  { %1965 = vmatpush1.bf16.msra.mxu1 %v1964_v1  ;;  %v236_v31 = vld [vmem:[%s3567_s4 + $0x1e8] sm:$0xff]  ;;  %v213_v34 = vld [vmem:[%s3567_s4 + $0x130] sm:$0xff]  ;;  %v218_v35 = vld [vmem:[%s3567_s4 + $0x158] sm:$0xff]  ;;  %v1976_v37 = vpack.c.bf16 %v227_v28, %v223_v27 }
  0x2c   :  { %1967 = vmatprep.subr.bf16.mxu1 %v1966_v2  ;;  %v222_v36 = vld [vmem:[%s3567_s4 + $0x178] sm:$0xff]  ;;  %v1978_v38 = vpack.c.bf16 %v236_v31, %v232_v30  ;;  %v231_v39 = vld [vmem:[%s3567_s4 + $0x1c0] sm:$0xff]  ;;  %v2032_v41 = vpack.c.bf16 %v213_v34, %v209_v33  ;;  %v240_v42 = vld [vmem:[%s3567_s4 + $0x208] sm:$0xff] }
  0x2d   :  { %2021 = vmatpush1.bf16.msra.mxu0 %v2020_v5  ;;  %v235_v40 = vld [vmem:[%s3567_s4 + $0x1e0] sm:$0xff]  ;;  %v244_v43 = vld [vmem:[%s3567_s4 + $0x228] sm:$0xff]  ;;  %v2034_v44 = vpack.c.bf16 %v222_v36, %v218_v35  ;;  %v217_v45 = vld [vmem:[%s3567_s4 + $0x150] sm:$0xff] }
  0x2e   :  { %2023 = vmatprep.subr.bf16.mxu0 %v2022_v8  ;;  %v221_v46 = vld [vmem:[%s3567_s4 + $0x170] sm:$0xff]  ;;  %v226_v47 = vld [vmem:[%s3567_s4 + $0x198] sm:$0xff]  ;;  %v1980_v49 = vpack.c.bf16 %v235_v40, %v231_v39  ;;  %v1982_v50 = vpack.c.bf16 %v244_v43, %v240_v42  ;;  %v239_v51 = vld [vmem:[%s3567_s4 + $0x200] sm:$0xff] }
  0x2f   :  { %1969 = vmatpush1.bf16.msra.mxu1 %v1968_v13  ;;  %v230_v48 = vld [vmem:[%s3567_s4 + $0x1b8] sm:$0xff]  ;;  %v243_v52 = vld [vmem:[%s3567_s4 + $0x220] sm:$0xff]  ;;  %v2036_v53 = vpack.c.bf16 %v221_v46, %v217_v45  ;;  %v248_v54 = vld [vmem:[%s3567_s4 + $0x248] sm:$0xff] }
  0x30   :  { %1971 = vmatprep.subr.bf16.mxu1 %v1970_v14  ;;  %v252_v55 = vld [vmem:[%s3567_s4 + $0x268] sm:$0xff]  ;;  %v2038_v56 = vpack.c.bf16 %v230_v48, %v226_v47  ;;  %v225_v57 = vld [vmem:[%s3567_s4 + $0x190] sm:$0xff]  ;;  %v234_v59 = vld [vmem:[%s3567_s4 + $0x1d8] sm:$0xff]  ;;  %v1984_v61 = vpack.c.bf16 %v243_v52, %v239_v51 }
  0x31   :  { %2025 = vmatpush1.bf16.msra.mxu0 %v2024_v17  ;;  %v229_v58 = vld [vmem:[%s3567_s4 + $0x1b0] sm:$0xff]  ;;  %v238_v60 = vld [vmem:[%s3567_s4 + $0x1f8] sm:$0xff]  ;;  %v1986_v62 = vpack.c.bf16 %v252_v55, %v248_v54  ;;  %v247_v63 = vld [vmem:[%s3567_s4 + $0x240] sm:$0xff] }
  0x32   :  { %2027 = vmatprep.subr.bf16.mxu0 %v2026_v20  ;;  %v251_v1 = vld [vmem:[%s3567_s4 + $0x260] sm:$0xff]  ;;  %v2040_v2 = vpack.c.bf16 %v229_v58, %v225_v57  ;;  %v256_v3 = vld [vmem:[%s3567_s4 + $0x288] sm:$0xff]  ;;  %v2042_v5 = vpack.c.bf16 %v238_v60, %v234_v59  ;;  %v233_v6 = vld [vmem:[%s3567_s4 + $0x1d0] sm:$0xff] }
  0x33   :  { %1973 = vmatpush1.bf16.msra.mxu1 %v1972_v25  ;;  %v260_v4 = vld [vmem:[%s3567_s4 + $0x2a8] sm:$0xff]  ;;  %v237_v7 = vld [vmem:[%s3567_s4 + $0x1f0] sm:$0xff]  ;;  %v242_v8 = vld [vmem:[%s3567_s4 + $0x218] sm:$0xff]  ;;  %v1988_v10 = vpack.c.bf16 %v251_v1, %v247_v63 }
  0x34   :  { %1975 = vmatprep.subr.bf16.mxu1 %v1974_v26  ;;  %v246_v9 = vld [vmem:[%s3567_s4 + $0x238] sm:$0xff]  ;;  %v1990_v11 = vpack.c.bf16 %v260_v4, %v256_v3  ;;  %v255_v12 = vld [vmem:[%s3567_s4 + $0x280] sm:$0xff]  ;;  %v2044_v14 = vpack.c.bf16 %v237_v7, %v233_v6  ;;  %v264_v15 = vld [vmem:[%s3567_s4 + $0x2c8] sm:$0xff] }
  0x35   :  { %2029 = vmatpush1.bf16.msra.mxu0 %v2028_v29  ;;  %v259_v13 = vld [vmem:[%s3567_s4 + $0x2a0] sm:$0xff]  ;;  %v268_v16 = vld [vmem:[%s3567_s4 + $0x2e8] sm:$0xff]  ;;  %v2046_v17 = vpack.c.bf16 %v246_v9, %v242_v8  ;;  %v241_v18 = vld [vmem:[%s3567_s4 + $0x210] sm:$0xff] }
  0x36   :  { %2031 = vmatprep.subr.bf16.mxu0 %v2030_v32  ;;  %v245_v19 = vld [vmem:[%s3567_s4 + $0x230] sm:$0xff]  ;;  %v250_v20 = vld [vmem:[%s3567_s4 + $0x258] sm:$0xff]  ;;  %v1992_v22 = vpack.c.bf16 %v259_v13, %v255_v12  ;;  %v1994_v23 = vpack.c.bf16 %v268_v16, %v264_v15  ;;  %v263_v24 = vld [vmem:[%s3567_s4 + $0x2c0] sm:$0xff] }
  0x37   :  { %1977 = vmatpush1.bf16.msra.mxu1 %v1976_v37  ;;  %v254_v21 = vld [vmem:[%s3567_s4 + $0x278] sm:$0xff]  ;;  %v267_v25 = vld [vmem:[%s3567_s4 + $0x2e0] sm:$0xff]  ;;  %v2048_v26 = vpack.c.bf16 %v245_v19, %v241_v18  ;;  %v272_v27 = vld [vmem:[%s3567_s4 + $0x308] sm:$0xff] }
  0x38   :  { %1979 = vmatprep.subr.bf16.mxu1 %v1978_v38  ;;  %v276_v28 = vld [vmem:[%s3567_s4 + $0x328] sm:$0xff]  ;;  %v2050_v29 = vpack.c.bf16 %v254_v21, %v250_v20  ;;  %v249_v30 = vld [vmem:[%s3567_s4 + $0x250] sm:$0xff]  ;;  %v258_v32 = vld [vmem:[%s3567_s4 + $0x298] sm:$0xff]  ;;  %v1996_v34 = vpack.c.bf16 %v267_v25, %v263_v24 }
  0x39   :  { %2033 = vmatpush1.bf16.msra.mxu0 %v2032_v41  ;;  %v253_v31 = vld [vmem:[%s3567_s4 + $0x270] sm:$0xff]  ;;  %v262_v33 = vld [vmem:[%s3567_s4 + $0x2b8] sm:$0xff]  ;;  %v1998_v35 = vpack.c.bf16 %v276_v28, %v272_v27  ;;  %v271_v36 = vld [vmem:[%s3567_s4 + $0x300] sm:$0xff] }
  0x3a   :  { %2035 = vmatprep.subr.bf16.mxu0 %v2034_v44  ;;  %v275_v37 = vld [vmem:[%s3567_s4 + $0x320] sm:$0xff]  ;;  %v2052_v38 = vpack.c.bf16 %v253_v31, %v249_v30  ;;  %v280_v39 = vld [vmem:[%s3567_s4 + $0x348] sm:$0xff]  ;;  %v2054_v41 = vpack.c.bf16 %v262_v33, %v258_v32  ;;  %v257_v42 = vld [vmem:[%s3567_s4 + $0x290] sm:$0xff] }
  0x3b   :  { %1981 = vmatpush1.bf16.msra.mxu1 %v1980_v49  ;;  %v284_v40 = vld [vmem:[%s3567_s4 + $0x368] sm:$0xff]  ;;  %v261_v43 = vld [vmem:[%s3567_s4 + $0x2b0] sm:$0xff]  ;;  %v266_v44 = vld [vmem:[%s3567_s4 + $0x2d8] sm:$0xff]  ;;  %v2000_v46 = vpack.c.bf16 %v275_v37, %v271_v36 }
  0x3c   :  { %1983 = vmatprep.subr.bf16.mxu1 %v1982_v50  ;;  %v270_v45 = vld [vmem:[%s3567_s4 + $0x2f8] sm:$0xff]  ;;  %v2002_v47 = vpack.c.bf16 %v284_v40, %v280_v39  ;;  %v279_v48 = vld [vmem:[%s3567_s4 + $0x340] sm:$0xff]  ;;  %v2056_v50 = vpack.c.bf16 %v261_v43, %v257_v42  ;;  %v288_v51 = vld [vmem:[%s3567_s4 + $0x388] sm:$0xff] }
  0x3d   :  { %2037 = vmatpush1.bf16.msra.mxu0 %v2036_v53  ;;  %v283_v49 = vld [vmem:[%s3567_s4 + $0x360] sm:$0xff]  ;;  %v292_v52 = vld [vmem:[%s3567_s4 + $0x3a8] sm:$0xff]  ;;  %v2058_v53 = vpack.c.bf16 %v270_v45, %v266_v44  ;;  %v265_v54 = vld [vmem:[%s3567_s4 + $0x2d0] sm:$0xff] }
  0x3e   :  { %2039 = vmatprep.subr.bf16.mxu0 %v2038_v56  ;;  %v269_v55 = vld [vmem:[%s3567_s4 + $0x2f0] sm:$0xff]  ;;  %v274_v56 = vld [vmem:[%s3567_s4 + $0x318] sm:$0xff]  ;;  %v2004_v58 = vpack.c.bf16 %v283_v49, %v279_v48  ;;  %v2006_v59 = vpack.c.bf16 %v292_v52, %v288_v51  ;;  %v291_v12 = vld [vmem:[%s3567_s4 + $0x3a0] sm:$0xff] }
  0x3f   :  { %1985 = vmatpush1.bf16.msra.mxu1 %v1984_v61  ;;  %v278_v57 = vld [vmem:[%s3567_s4 + $0x338] sm:$0xff]  ;;  %v2060_v60 = vpack.c.bf16 %v269_v55, %v265_v54  ;;  %v277_v63 = vld [vmem:[%s3567_s4 + $0x330] sm:$0xff]  ;;  %v300_v18 = vld [vmem:[%s3567_s4 + $0x3e8] sm:$0xff] }
  0x40   :  { %1987 = vmatprep.subr.bf16.mxu1 %v1986_v62  ;;  %v2062_v61 = vpack.c.bf16 %v278_v57, %v274_v56  ;;  %v273_v62 = vld [vmem:[%s3567_s4 + $0x310] sm:$0xff]  ;;  %v282_v1 = vld [vmem:[%s3567_s4 + $0x358] sm:$0xff]  ;;  %v488_v30 = vld [vmem:[%s3569_s6 + $0x88] sm:$0xff] }
  0x41   :  { %2041 = vmatpush1.bf16.msra.mxu0 %v2040_v2  ;;  %v286_v2 = vld [vmem:[%s3567_s4 + $0x378] sm:$0xff]  ;;  %v2064_v3 = vpack.c.bf16 %v277_v63, %v273_v62  ;;  %v285_v6 = vld [vmem:[%s3567_s4 + $0x370] sm:$0xff]  ;;  %v519_v31 = vld [vmem:[%s3569_s6 + $0x180] sm:$0xff] }
  0x42   :  { %2043 = vmatprep.subr.bf16.mxu0 %v2042_v5  ;;  %v2066_v4 = vpack.c.bf16 %v286_v2, %v282_v1  ;;  %v281_v5 = vld [vmem:[%s3567_s4 + $0x350] sm:$0xff]  ;;  %v290_v7 = vld [vmem:[%s3567_s4 + $0x398] sm:$0xff]  ;;  %v520_v33 = vld [vmem:[%s3569_s6 + $0x188] sm:$0xff] }
  0x43   :  { %1989 = vmatpush1.bf16.msra.mxu1 %v1988_v10  ;;  %v294_v8 = vld [vmem:[%s3567_s4 + $0x3b8] sm:$0xff]  ;;  %v2068_v9 = vpack.c.bf16 %v285_v6, %v281_v5  ;;  %v289_v13 = vld [vmem:[%s3567_s4 + $0x390] sm:$0xff]  ;;  %v471_v43 = vld [vmem:[%s3569_s6] sm:$0xff] }
  0x44   :  { %1991 = vmatprep.subr.bf16.mxu1 %v1990_v11  ;;  %v2070_v10 = vpack.c.bf16 %v294_v8, %v290_v7  ;;  %v287_v11 = vld [vmem:[%s3567_s4 + $0x380] sm:$0xff]  ;;  %v293_v15 = vld [vmem:[%s3567_s4 + $0x3b0] sm:$0xff]  ;;  %v298_v19 = vld [vmem:[%s3567_s4 + $0x3d8] sm:$0xff] }
  0x45   :  { %2045 = vmatpush1.bf16.msra.mxu0 %v2044_v14  ;;  %v2008_v14 = vpack.c.bf16 %v291_v12, %v287_v11  ;;  %v2072_v16 = vpack.c.bf16 %v293_v15, %v289_v13  ;;  %v302_v21 = vld [vmem:[%s3567_s4 + $0x3f8] sm:$0xff]  ;;  %v301_v27 = vld [vmem:[%s3567_s4 + $0x3f0] sm:$0xff]  ;;  %v472_v44 = vld [vmem:[%s3569_s6 + $0x8] sm:$0xff] }
  0x46   :  { %2047 = vmatprep.subr.bf16.mxu0 %v2046_v17  ;;  %v296_v17 = vld [vmem:[%s3567_s4 + $0x3c8] sm:$0xff]  ;;  %v2074_v24 = vpack.c.bf16 %v302_v21, %v298_v19  ;;  %v489_v49 = vld [vmem:[%s3569_s6 + $0x90] sm:$0xff]  ;;  %v490_v51 = vld [vmem:[%s3569_s6 + $0x98] sm:$0xff]  ;;  %v2080_v55 = vpack.c.bf16 %v472_v44, %v471_v43 }
  0x47   :  { %1993 = vmatpush1.bf16.msra.mxu1 %v1992_v22  ;;  %v2010_v20 = vpack.c.bf16 %v300_v18, %v296_v17  ;;  %v295_v22 = vld [vmem:[%s3567_s4 + $0x3c0] sm:$0xff]  ;;  %v504_v48 = vld [vmem:[%s3569_s6 + $0x108] sm:$0xff]  ;;  %v521_v52 = vld [vmem:[%s3569_s6 + $0x190] sm:$0xff] }
  0x48   :  { %1995 = vmatprep.subr.bf16.mxu1 %v1994_v23  ;;  %v299_v23 = vld [vmem:[%s3567_s4 + $0x3e0] sm:$0xff]  ;;  %v473_v57 = vld [vmem:[%s3569_s6 + $0x10] sm:$0xff]  ;;  %v506_v63 = vld [vmem:[%s3569_s6 + $0x118] sm:$0xff] }
  0x49   :  { %2049 = vmatpush1.bf16.msra.mxu0 %v2048_v26  ;;  %v2012_v25 = vpack.c.bf16 %v299_v23, %v295_v22  ;;  %v297_v26 = vld [vmem:[%s3567_s4 + $0x3d0] sm:$0xff]  ;;  %v491_v1 = vld [vmem:[%s3569_s6 + $0xa0] sm:$0xff]  ;;  %v492_v2 = vld [vmem:[%s3569_s6 + $0xa8] sm:$0xff]  ;;  %s2526_s4 = smov 16  }
  0x4a   :  { %2051 = vmatprep.subr.bf16.mxu0 %v2050_v29  ;;  %v2076_v28 = vpack.c.bf16 %v301_v27, %v297_v26  ;;  %v487_v29 = vld [vmem:[%s3569_s6 + $0x80] sm:$0xff]  ;;  %v505_v62 = vld [vmem:[%s3569_s6 + $0x110] sm:$0xff]  ;;  %v476_v8 = vld [vmem:[%s3569_s6 + $0x28] sm:$0xff] }
  0x4b   :  { %1997 = vmatpush1.bf16.msra.mxu1 %v1996_v34  ;;  %v2078_v32 = vpack.c.bf16 %v488_v30, %v487_v29  ;;  %v2110_v34 = vpack.c.bf16 %v520_v33, %v519_v31  ;;  %v2116_v6 = vpack.c.bf16 %v506_v63, %v505_v62  ;;  %v475_v7 = vld [vmem:[%s3569_s6 + $0x20] sm:$0xff]  ;;  %v508_v12 = vld [vmem:[%s3569_s6 + $0x128] sm:$0xff]  ;;  %v493_v13 = vld [vmem:[%s3569_s6 + $0xb0] sm:$0xff] }
  0x4c   :  { %1999 = vmatprep.subr.bf16.mxu1 %v1998_v35  ;;  %v88_v35 = vlaneseq  ;;  %v507_v11 = vld [vmem:[%s3569_s6 + $0x120] sm:$0xff]  ;;  %v525_v15 = vld [vmem:[%s3569_s6 + $0x1b0] sm:$0xff]  ;;  %v2088_v17 = vpack.c.bf16 %v476_v8, %v475_v7  ;;  %v496_v26 = vld [vmem:[%s3569_s6 + $0xc8] sm:$0xff] }
  0x4d   :  { %2053 = vmatpush1.bf16.msra.mxu0 %v2052_v38  ;;  %v86_v38 = vld [vmem:[%s3566_s3] sm:$0x3]  ;;  %v2120_v18 = vpack.c.bf16 %v508_v12, %v507_v11  ;;  %v477_v19 = vld [vmem:[%s3569_s6 + $0x30] sm:$0xff]  ;;  %v530_v43 = vld [vmem:[%s3569_s6 + $0x1d8] sm:$0xff] }
  0x4e   :  { %2055 = vmatprep.subr.bf16.mxu0 %v2054_v41  ;;  %v3081_v36 = vshrl.u32 %v88_v35, 7  ;;  %v509_v23 = vld [vmem:[%s3569_s6 + $0x130] sm:$0xff]  ;;  %v527_v27 = vld [vmem:[%s3569_s6 + $0x1c0] sm:$0xff]  ;;  %v534_v7 = vld [vmem:[%s3569_s6 + $0x1f8] sm:$0xff] }
  0x4f   :  { %2001 = vmatpush1.bf16.msra.mxu1 %v2000_v46  ;;  %v479_v31 = vld [vmem:[%s3569_s6 + $0x40] sm:$0xff]  ;;  %v485_v8 = vld [vmem:[%s3569_s6 + $0x70] sm:$0xff] }
  0x50   :  { %2003 = vmatprep.subr.bf16.mxu1 %v2002_v47  ;;  %v3084_v37 = vsub.s32 0, %v3081_v36  ;;  %v3090_v39 = vsub.s32 1, %v3081_v36  ;;  %v503_v47 = vld [vmem:[%s3569_s6 + $0x100] sm:$0xff]  ;;  %v517_v12 = vld [vmem:[%s3569_s6 + $0x170] sm:$0xff] }
  0x51   :  { %2057 = vmatpush1.bf16.msra.mxu0 %v2056_v50  ;;  %v2112_v56 = vpack.c.bf16 %v504_v48, %v503_v47  ;;  %v511_v35 = vld [vmem:[%s3569_s6 + $0x140] sm:$0xff]  ;;  %v482_v47 = vld [vmem:[%s3569_s6 + $0x58] sm:$0xff] }
  0x52   :  { %2059 = vmatprep.subr.bf16.mxu0 %v2058_v53  ;;  %v91_v40 = vrot.slane %v86_v38, %v3084_v37  ;;  %v95_v41 = vrot.slane %v86_v38, %v3090_v39  ;;  %v522_v53 = vld [vmem:[%s3569_s6 + $0x198] sm:$0xff]  ;;  %v512_v38 = vld [vmem:[%s3569_s6 + $0x148] sm:$0xff]  ;;  %v515_v62 = vld [vmem:[%s3569_s6 + $0x160] sm:$0xff] }
  0x53   :  { %2005 = vmatpush1.bf16.msra.mxu1 %v2004_v58  ;;  %v474_v58 = vld [vmem:[%s3569_s6 + $0x18] sm:$0xff] }
  0x54   :  { %2007 = vmatprep.subr.bf16.mxu1 %v2006_v59  ;;  %v2084_v5 = vpack.c.bf16 %v474_v58, %v473_v57 }
  0x55   :  { %2061 = vmatpush1.bf16.msra.mxu0 %v2060_v60  ;;  %v2082_v60 = vpack.c.bf16 %v490_v51, %v489_v49  ;;  %v514_v51 = vld [vmem:[%s3569_s6 + $0x158] sm:$0xff] }
  0x56   :  { %2063 = vmatprep.subr.bf16.mxu0 %v2062_v61  ;;  %v2114_v61 = vpack.c.bf16 %v522_v53, %v521_v52  ;;  %v499_v52 = vld [vmem:[%s3569_s6 + $0xe0] sm:$0xff]  ;;  %v500_v53 = vld [vmem:[%s3569_s6 + $0xe8] sm:$0xff] }
  0x57   :  { %2009 = vmatpush1.bf16.msra.mxu1 %v2008_v14  ;;  %v494_v14 = vld [vmem:[%s3569_s6 + $0xb8] sm:$0xff]  ;;  %v2102_v58 = vpack.c.bf16 %v500_v53, %v499_v52  ;;  %v869_v52 = vld [vmem:[#allocation2 + $0x8] sm:$0xff] }
  0x58   :  { %2011 = vmatprep.subr.bf16.mxu1 %v2010_v20  ;;  %v478_v20 = vld [vmem:[%s3569_s6 + $0x38] sm:$0xff]  ;;  %v2090_v21 = vpack.c.bf16 %v494_v14, %v493_v13  ;;  %v873_v53 = vld [vmem:[#allocation2 + $0x28] sm:$0xff] }
  0x59   :  { %2065 = vmatpush1.bf16.msra.mxu0 %v2064_v3  ;;  %v523_v3 = vld [vmem:[%s3569_s6 + $0x1a0] sm:$0xff]  ;;  %v2092_v29 = vpack.c.bf16 %v478_v20, %v477_v19  ;;  %v518_v13 = vld [vmem:[%s3569_s6 + $0x178] sm:$0xff] }
  0x5a   :  { %2067 = vmatprep.subr.bf16.mxu0 %v2066_v4  ;;  %v524_v4 = vld [vmem:[%s3569_s6 + $0x1a8] sm:$0xff]  ;;  %v2140_v14 = vpack.c.bf16 %v518_v13, %v517_v12 }
  0x5b   :  { %2013 = vmatpush1.bf16.msra.mxu1 %v2012_v25  ;;  %v495_v25 = vld [vmem:[%s3569_s6 + $0xc0] sm:$0xff] }
  0x5c   :  { %2079 = vmatprep.subr.bf16.mxu1 %v2078_v32  ;;  %v480_v32 = vld [vmem:[%s3569_s6 + $0x48] sm:$0xff]  ;;  %v2094_v33 = vpack.c.bf16 %v496_v26, %v495_v25 }
  0x5d   :  { %2069 = vmatpush1.bf16.msra.mxu0 %v2068_v9  ;;  %v2086_v9 = vpack.c.bf16 %v492_v2, %v491_v1  ;;  %v2096_v44 = vpack.c.bf16 %v480_v32, %v479_v31  ;;  %v516_v1 = vld [vmem:[%s3569_s6 + $0x168] sm:$0xff] }
  0x5e   :  { %2071 = vmatprep.subr.bf16.mxu0 %v2070_v10  ;;  %v2118_v10 = vpack.c.bf16 %v524_v4, %v523_v3  ;;  %v2136_v2 = vpack.c.bf16 %v516_v1, %v515_v62  ;;  %v501_v3 = vld [vmem:[%s3569_s6 + $0xf0] sm:$0xff]  ;;  %v502_v4 = vld [vmem:[%s3569_s6 + $0xf8] sm:$0xff]  ;;  %v872_v62 = vld [vmem:[#allocation2 + $0x20] sm:$0xff] }
  0x5f   :  { %v874_v1 = vld [vmem:[#allocation2 + $0x30] sm:$0xff] }
  0x61   :  { %2073 = vmatpush1.bf16.msra.mxu0 %v2072_v16  ;;  %v526_v16 = vld [vmem:[%s3569_s6 + $0x1b8] sm:$0xff] }
  0x62   :  { %2075 = vmatprep.subr.bf16.mxu0 %v2074_v24  ;;  %v2122_v22 = vpack.c.bf16 %v526_v16, %v525_v15  ;;  %v510_v24 = vld [vmem:[%s3569_s6 + $0x138] sm:$0xff]  ;;  %v685_v15 = vld [vmem:[%s3584_s2] sm:$0x3]  ;;  %v3278_v16 = vsub.s32 2, %v3081_v36 }
  0x63   :  { %v2124_v30 = vpack.c.bf16 %v510_v24, %v509_v23  ;;  %687 = vrot.lane.b32.xlu0 %v685_v15, %s2525_s28  ;;  %v882_v15 = vld [vmem:[#allocation2 + $0x70] sm:$0xff] }
  0x65   :  { %2077 = vmatpush1.bf16.msra.mxu0 %v2076_v28  ;;  %v528_v28 = vld [vmem:[%s3569_s6 + $0x1c8] sm:$0xff] }
  0x66   :  { %2111 = vmatprep.subr.bf16.mxu0 %v2110_v34  ;;  %v2126_v34 = vpack.c.bf16 %v528_v28, %v527_v27 }
  0xfb   :  { %v168_v42 = vpop.f32.mrb[0].mxu0 }
  0xfc   :  { %v169_v45 = vadd.f32 %v168_v42, %v91_v40  ;;  %v170_v46 = vpop.f32.mrb[1].mxu0  ;;  %v497_v40 = vld [vmem:[%s3569_s6 + $0xd0] sm:$0xff] }
  0xfd   :  { %v171_v50 = vadd.f32 %v170_v46, %v95_v41  ;;  %v498_v41 = vld [vmem:[%s3569_s6 + $0xd8] sm:$0xff]  ;;  %v529_v42 = vld [vmem:[%s3569_s6 + $0x1d0] sm:$0xff] }
  0xfe   :  { %v173_v59 = vmax.f32 %v169_v45, 0.0  ;;  %v2128_v45 = vpack.c.bf16 %v512_v38, %v511_v35  ;;  %v481_v46 = vld [vmem:[%s3569_s6 + $0x50] sm:$0xff]  ;;  %v2098_v48 = vpack.c.bf16 %v498_v41, %v497_v40  ;;  %v2130_v49 = vpack.c.bf16 %v530_v43, %v529_v42  ;;  %v696_v35 = vld [vmem:[%s3571_s8] sm:$0xff] }
  0xff   :  { %v174_v54 = vmax.f32 %v171_v50, 0.0  ;;  %v513_v50 = vld [vmem:[%s3569_s6 + $0x150] sm:$0xff]  ;;  %v1760_v41 = vld [vmem:[%s3570_s7] ss:$0 sm:$0xff]  ;;  %s2527_s7 = smov 120  }
 0x100   :  { %v2132_v57 = vpack.c.bf16 %v514_v51, %v513_v50  ;;  %v699_v50 = vld [vmem:[%s3571_s8 + $0x18] sm:$0xff]  ;;  %v698_v51 = vld [vmem:[%s3571_s8 + $0x10] sm:$0xff] }
 0x101   :  { %389 = vmatprep.mubr.f32.mxu1 %v174_v54  ;;  %460 = vmatprep.mubr.f32.mxu0 %v174_v54  ;;  %v531_v54 = vld [vmem:[%s3569_s6 + $0x1e0] sm:$0xff] }
 0x102   :  { %390 = vmatmul.mubr.f32.vlgmr.msra.gmra.mrb[0].mxu1 %v173_v59  ;;  %461 = vmatmul.mubr.f32.vlgmr.msra.gmra.mrb[2].mxu0 %v173_v59 }
 0x103   :  { %2081 = vmatpush3.bf16.msra.mxu1 %v2080_v55  ;;  %2113 = vmatpush3.bf16.msra.mxu0 %v2112_v56  ;;  %v532_v55 = vld [vmem:[%s3569_s6 + $0x1e8] sm:$0xff]  ;;  %v2100_v56 = vpack.c.bf16 %v482_v47, %v481_v46 }
 0x104   :  { %2083 = vmatprep.subr.bf16.mxu1 %v2082_v60  ;;  %2115 = vmatprep.subr.bf16.mxu0 %v2114_v61  ;;  %v2134_v59 = vpack.c.bf16 %v532_v55, %v531_v54  ;;  %v483_v60 = vld [vmem:[%s3569_s6 + $0x60] sm:$0xff]  ;;  %v484_v61 = vld [vmem:[%s3569_s6 + $0x68] sm:$0xff]  ;;  %v871_v54 = vld [vmem:[#allocation2 + $0x18] sm:$0xff]  ;;  %v2142_v55 = vpack.c.bf16 %v873_v53, %v869_v52 }
 0x105   :  { %v2104_v63 = vpack.c.bf16 %v484_v61, %v483_v60  ;;  %v868_v61 = vld [vmem:[#allocation2] sm:$0xff] }
 0x106   :  { %v900_v53 = vld [vmem:[#allocation2 + $0x100] sm:$0xff] }
 0x107   :  { %2085 = vmatpush3.bf16.msra.mxu1 %v2084_v5  ;;  %2117 = vmatpush3.bf16.msra.mxu0 %v2116_v6  ;;  %v533_v5 = vld [vmem:[%s3569_s6 + $0x1f0] sm:$0xff]  ;;  %v2106_v6 = vpack.c.bf16 %v502_v4, %v501_v3  ;;  %v881_v3 = vld [vmem:[#allocation2 + $0x68] sm:$0xff]  ;;  %v879_v4 = vld [vmem:[#allocation2 + $0x58] sm:$0xff] }
 0x108   :  { %2087 = vmatprep.subr.bf16.mxu1 %v2086_v9  ;;  %2119 = vmatprep.subr.bf16.mxu0 %v2118_v10  ;;  %v486_v9 = vld [vmem:[%s3569_s6 + $0x78] sm:$0xff]  ;;  %v2138_v10 = vpack.c.bf16 %v534_v7, %v533_v5  ;;  %v2144_v7 = vpack.c.bf16 %v872_v62, %v868_v61 }
 0x109   :  { %v2108_v11 = vpack.c.bf16 %v486_v9, %v485_v8  ;;  %v883_v5 = vld [vmem:[#allocation2 + $0x78] sm:$0xff]  ;;  %v876_v9 = vld [vmem:[#allocation2 + $0x40] sm:$0xff] }
 0x10a   :  { %v2274_v13 = vpack.c.bf16 %v883_v5, %v879_v4  ;;  %v911_v61 = vld [vmem:[#allocation2 + $0x158] sm:$0xff] }
 0x10b   :  { %2089 = vmatpush3.bf16.msra.mxu1 %v2088_v17  ;;  %2121 = vmatpush3.bf16.msra.mxu0 %v2120_v18  ;;  %v303_v17 = vld [vmem:[%s3568_s5] sm:$0xf]  ;;  %v3284_v18 = vsub.s32 3, %v3081_v36  ;;  %v915_v62 = vld [vmem:[#allocation2 + $0x178] sm:$0xff] }
 0x10c   :  { %2091 = vmatprep.subr.bf16.mxu1 %v2090_v21  ;;  %2123 = vmatprep.subr.bf16.mxu0 %v2122_v22  ;;  %v308_v19 = vrot.slane %v303_v17, %v3084_v37  ;;  %v316_v20 = vrot.slane %v303_v17, %v3278_v16  ;;  %v312_v21 = vrot.slane %v303_v17, %v3090_v39 }
 0x10d   :  { %v320_v22 = vrot.slane %v303_v17, %v3284_v18  ;;  %v885_v17 = vld [vmem:[#allocation2 + $0x88] sm:$0xff]  ;;  %v2290_v5 = vpack.c.bf16 %v915_v62, %v911_v61  ;;  %v951_v62 = vld [vmem:[#allocation2 + $0x298] sm:$0xff] }
 0x10e   :  { %v953_v61 = vld [vmem:[#allocation2 + $0x2a8] sm:$0xff] }
 0x10f   :  { %2093 = vmatpush3.bf16.msra.mxu1 %v2092_v29  ;;  %2125 = vmatpush3.bf16.msra.mxu0 %v2124_v30 }
 0x110   :  { %2095 = vmatprep.subr.bf16.mxu1 %v2094_v33  ;;  %2127 = vmatprep.subr.bf16.mxu0 %v2126_v34  ;;  %v697_v34 = vld [vmem:[%s3571_s8 + $0x8] sm:$0xff] }
 0x113   :  { %2097 = vmatpush3.bf16.msra.mxu1 %v2096_v44  ;;  %2129 = vmatpush3.bf16.msra.mxu0 %v2128_v45 }
 0x114   :  { %2099 = vmatprep.subr.bf16.mxu1 %v2098_v48  ;;  %2131 = vmatprep.subr.bf16.mxu0 %v2130_v49 }
 0x117   :  { %2101 = vmatpush3.bf16.msra.mxu1 %v2100_v56  ;;  %2133 = vmatpush3.bf16.msra.mxu0 %v2132_v57  ;;  %v875_v56 = vld [vmem:[#allocation2 + $0x38] sm:$0xff] }
 0x118   :  { %2103 = vmatprep.subr.bf16.mxu1 %v2102_v58  ;;  %2135 = vmatprep.subr.bf16.mxu0 %v2134_v59  ;;  %v2270_v57 = vpack.c.bf16 %v875_v56, %v871_v54  ;;  %v688_v58 = vpop.permute.xlu0 %687  ;;  %v904_v54 = vld [vmem:[#allocation2 + $0x120] sm:$0xff] }
 0x11b   :  { %2105 = vmatpush3.bf16.msra.mxu1 %v2104_v63  ;;  %2137 = vmatpush3.bf16.msra.mxu0 %v2136_v2  ;;  %v870_v63 = vld [vmem:[#allocation2 + $0x10] sm:$0xff]  ;;  %v877_v2 = vld [vmem:[#allocation2 + $0x48] sm:$0xff] }
 0x11c   :  { %2107 = vmatprep.subr.bf16.mxu1 %v2106_v6  ;;  %2139 = vmatprep.subr.bf16.mxu0 %v2138_v10  ;;  %v2272_v8 = vpack.c.bf16 %v874_v1, %v870_v63  ;;  %v880_v10 = vld [vmem:[#allocation2 + $0x60] sm:$0xff]  ;;  %v2146_v12 = vpack.c.bf16 %v881_v3, %v877_v2  ;;  %v2160_v63 = vpack.c.bf16 %v904_v54, %v900_v53 }
 0x11d   :  { %v908_v2 = vld [vmem:[#allocation2 + $0x140] sm:$0xff] }
 0x11e   :  { %v912_v3 = vld [vmem:[#allocation2 + $0x160] sm:$0xff] }
 0x11f   :  { %2109 = vmatpush3.bf16.msra.mxu1 %v2108_v11  ;;  %2141 = vmatpush3.bf16.msra.mxu0 %v2140_v14  ;;  %v878_v14 = vld [vmem:[#allocation2 + $0x50] sm:$0xff]  ;;  %v940_v54 = vld [vmem:[#allocation2 + $0x240] sm:$0xff] }
 0x120   :  { %726 = vmatprep.subr.mxu0 %v697_v34  ;;  %797 = vmatprep.subr.mxu1 %v699_v50  ;;  %v895_v34 = vld [vmem:[#allocation2 + $0xd8] sm:$0xff] }
 0x121   :  { %v907_v50 = vld [vmem:[#allocation2 + $0x138] sm:$0xff] }
 0x1d5   :  { %v391_v23 = vpop.f32.mrb[0].mxu1  ;;  %v462_v24 = vpop.f32.mrb[2].mxu0 }
 0x1d6   :  { %v392_v25 = vadd.f32 %v391_v23, %v308_v19  ;;  %v463_v26 = vadd.f32 %v462_v24, %v316_v20  ;;  %v393_v27 = vpop.f32.mrb[1].mxu1  ;;  %v464_v28 = vpop.f32.mrb[3].mxu0  ;;  %v889_v19 = vld [vmem:[#allocation2 + $0xa8] sm:$0xff]  ;;  %v887_v20 = vld [vmem:[#allocation2 + $0x98] sm:$0xff] }
 0x1d7   :  { %v394_v29 = vadd.f32 %v393_v27, %v312_v21  ;;  %v465_v30 = vadd.f32 %v464_v28, %v320_v22  ;;  %v891_v21 = vld [vmem:[#allocation2 + $0xb8] sm:$0xff]  ;;  %v884_v27 = vld [vmem:[#allocation2 + $0x80] sm:$0xff] }
 0x1d8   :  { %v467_v36 = vmax.f32 %v392_v25, 0.0  ;;  %v469_v33 = vmax.f32 %v463_v26, 0.0  ;;  %v2148_v25 = vpack.c.bf16 %v880_v10, %v876_v9  ;;  %v2276_v26 = vpack.c.bf16 %v882_v15, %v878_v14  ;;  %v888_v28 = vld [vmem:[#allocation2 + $0xa0] sm:$0xff]  ;;  %v921_v9 = vld [vmem:[#allocation2 + $0x1a8] sm:$0xff]  ;;  %v919_v10 = vld [vmem:[#allocation2 + $0x198] sm:$0xff] }
 0x1d9   :  { %v468_v31 = vmax.f32 %v394_v29, 0.0  ;;  %v470_v32 = vmax.f32 %v465_v30, 0.0  ;;  %v2150_v29 = vpack.c.bf16 %v889_v19, %v885_v17  ;;  %v2278_v30 = vpack.c.bf16 %v891_v21, %v887_v20  ;;  %v916_v14 = vld [vmem:[#allocation2 + $0x180] sm:$0xff]  ;;  %v918_v20 = vld [vmem:[#allocation2 + $0x190] sm:$0xff] }
 0x1da   :  { %v920_v15 = vld [vmem:[#allocation2 + $0x1a0] sm:$0xff]  ;;  %v922_v21 = vld [vmem:[#allocation2 + $0x1b0] sm:$0xff] }
 0x1db   :  { %606 = vmatprep.mubr.f32.mxu1 %v468_v31  ;;  %676 = vmatprep.mubr.f32.mxu0 %v470_v32  ;;  %v886_v31 = vld [vmem:[#allocation2 + $0x90] sm:$0xff] }
 0x1dc   :  { %607 = vmatmul.mubr.f32.vlgmr.msra.gmra.mrb[2].mxu1 %v467_v36  ;;  %677 = vmatmul.mubr.f32.vlgmr.msra.gmra.mrb[4].mxu0 %v469_v33  ;;  %v890_v32 = vld [vmem:[#allocation2 + $0xb0] sm:$0xff]  ;;  %v893_v36 = vld [vmem:[#allocation2 + $0xc8] sm:$0xff] }
 0x1dd   :  { %790 = vmatprep.mubr.f32.mxu0 %v2524_v0  ;;  %861 = vmatprep.mubr.f32.mxu1 %v2524_v0  ;;  %v897_v33 = vld [vmem:[#allocation2 + $0xe8] sm:$0xff] }
 0x1de   :  { %727 = vmatpush1.msra.mxu0 %v696_v35  ;;  %798 = vmatpush1.msra.mxu1 %v698_v51  ;;  %v899_v35 = vld [vmem:[#allocation2 + $0xf8] sm:$0xff] }
 0x1df   :  { %2143 = vmatprep.subr.bf16.mxu1 %v2142_v55  ;;  %2271 = vmatprep.subr.bf16.mxu0 %v2270_v57  ;;  %v902_v57 = vld [vmem:[#allocation2 + $0x110] sm:$0xff] }
 0x2af   :  { %v1798_v38 = vpop.f32.mrb[2].mxu1  ;;  %v1833_v40 = vpop.f32.mrb[4].mxu0 }
 0x2b0   :  { %v1799_v42 = vpop.f32.mrb[3].mxu1  ;;  %v1834_v43 = vpop.f32.mrb[5].mxu0 }
 0x2b1   :  { %v1800_v44 = vadd.f32 %v1799_v42, %v1798_v38  ;;  %v1835_v45 = vadd.f32 %v1834_v43, %v1833_v40  ;;  %v2152_v38 = vpack.c.bf16 %v888_v28, %v884_v27  ;;  %v2280_v40 = vpack.c.bf16 %v890_v32, %v886_v31  ;;  %v896_v42 = vld [vmem:[#allocation2 + $0xe0] sm:$0xff]  ;;  %v926_v32 = vld [vmem:[#allocation2 + $0x1d0] sm:$0xff] }
 0x2b2   :  { %v2154_v43 = vpack.c.bf16 %v897_v33, %v893_v36  ;;  %v2296_v27 = vpack.c.bf16 %v922_v21, %v918_v20  ;;  %v924_v28 = vld [vmem:[#allocation2 + $0x1c0] sm:$0xff]  ;;  %v930_v36 = vld [vmem:[#allocation2 + $0x1f0] sm:$0xff]  ;;  %v933_v33 = vld [vmem:[#allocation2 + $0x208] sm:$0xff] }
 0x2b3   :  { %v609_v46 = vadd.f32 %v1800_v44, %v1760_v41  ;;  %v892_v41 = vld [vmem:[#allocation2 + $0xc0] sm:$0xff]  ;;  %v2282_v44 = vpack.c.bf16 %v899_v35, %v895_v34  ;;  %v937_v34 = vld [vmem:[#allocation2 + $0x228] sm:$0xff]  ;;  %v935_v35 = vld [vmem:[#allocation2 + $0x218] sm:$0xff] }
 0x2b4   :  { %v2156_v51 = vpack.c.bf16 %v896_v42, %v892_v41  ;;  %v2300_v41 = vpack.c.bf16 %v930_v36, %v926_v32  ;;  %v932_v42 = vld [vmem:[#allocation2 + $0x200] sm:$0xff]  ;;  %v958_v21 = vld [vmem:[#allocation2 + $0x2d0] sm:$0xff] }
 0x2b5   :  { %v679_v47 = vadd.f32 %v1835_v45, %v609_v46  ;;  %v894_v45 = vld [vmem:[#allocation2 + $0xd0] sm:$0xff] }
 0x2b6   :  { %v898_v46 = vld [vmem:[#allocation2 + $0xf0] sm:$0xff] }
 0x2b7   :  { %v682_v48 = vmul.f32 0.5, %v679_v47  ;;  %1740 = vrot.lane.b32.xlu1 %v679_v47, %s2526_s4  ;;  %v2284_v52 = vpack.c.bf16 %v898_v46, %v894_v45  ;;  %v934_v46 = vld [vmem:[#allocation2 + $0x210] sm:$0xff] }
 0x2b8   :  { %v966_v36 = vld [vmem:[#allocation2 + $0x310] sm:$0xff] }
 0x2b9   :  { %v683_v49 = vmul.f32 1.442695, %v682_v48  ;;  %v905_v48 = vld [vmem:[#allocation2 + $0x128] sm:$0xff] }
 0x2bb   :  { %2491 = vpow2.f32 %v683_v49  ;;  %v903_v49 = vld [vmem:[#allocation2 + $0x118] sm:$0xff] }
 0x2bc   :  { %v2286_v56 = vpack.c.bf16 %v907_v50, %v903_v49  ;;  %v945_v49 = vld [vmem:[#allocation2 + $0x268] sm:$0xff]  ;;  %v943_v50 = vld [vmem:[#allocation2 + $0x258] sm:$0xff] }
 0x2c5   :  { %v2492_v59 = vpop.eup %2491 }
 0x2c6   :  { %v690_v60 = vmul.f32 %v2492_v59, %v688_v58  ;;  %v906_v58 = vld [vmem:[#allocation2 + $0x130] sm:$0xff]  ;;  %v909_v59 = vld [vmem:[#allocation2 + $0x148] sm:$0xff] }
 0x2c7   :  { %v2288_v1 = vpack.c.bf16 %v906_v58, %v902_v57  ;;  %v942_v58 = vld [vmem:[#allocation2 + $0x250] sm:$0xff] }
 0x2c8   :  { %692 = vrot.lane.b32.xlu0 %v690_v60, %s2527_s7  ;;  %v913_v60 = vld [vmem:[#allocation2 + $0x168] sm:$0xff] }
 0x2c9   :  { %v2162_v4 = vpack.c.bf16 %v913_v60, %v909_v59  ;;  %v946_v59 = vld [vmem:[#allocation2 + $0x270] sm:$0xff]  ;;  %v949_v60 = vld [vmem:[#allocation2 + $0x288] sm:$0xff] }
 0x329   :  { %v1741_v22 = vpop.permute.xlu1 %1740 }
 0x33a   :  { %v693_v6 = vpop.permute.xlu0 %692 }
 0x33b   :  { %v695_v11 = vadd.f32 %v693_v6, %v679_v47  ;;  %v910_v6 = vld [vmem:[#allocation2 + $0x150] sm:$0xff] }
 0x33d   :  { %v1743_v23 = vsel %vm722_vm1, %v695_v11, %v679_v47  ;;  %1761 = vmatmul.mubr.msk.f32.vlgmr.msra.gmra.mrb[6].mxu0 %vm722_vm1, %v695_v11  ;;  %1762 = vmatmul.mubr.msk.f32.vlgmr.msra.gmra.mrb[4].mxu1 %vm722_vm1, %v695_v11  ;;  %v901_v47 = vld [vmem:[#allocation2 + $0x108] sm:$0xff]  ;;  %v923_v11 = vld [vmem:[#allocation2 + $0x1b8] sm:$0xff] }
 0x33e   :  { %v1745_v24 = vsel %vm1744_vm2, %v1743_v23, %v1741_v22  ;;  %2145 = vmatpush1.bf16.msra.mxu1 %v2144_v7  ;;  %2273 = vmatpush1.bf16.msra.mxu0 %v2272_v8  ;;  %v2158_v55 = vpack.c.bf16 %v905_v48, %v901_v47  ;;  %v914_v7 = vld [vmem:[#allocation2 + $0x170] sm:$0xff]  ;;  %v917_v8 = vld [vmem:[#allocation2 + $0x188] sm:$0xff]  ;;  %v2294_v19 = vpack.c.bf16 %v923_v11, %v919_v10  ;;  %v959_v11 = vld [vmem:[#allocation2 + $0x2d8] sm:$0xff] }
 0x33f   :  { %1747 = vst.msk [vmem:[%s3579_s16] sm:$0x3] %vm1746_vm3, %v1745_v24  ;;  %2147 = vmatprep.subr.bf16.mxu1 %v2146_v12  ;;  %2275 = vmatprep.subr.bf16.mxu0 %v2274_v13  ;;  %v2164_v12 = vpack.c.bf16 %v912_v3, %v908_v2  ;;  %v2292_v13 = vpack.c.bf16 %v914_v7, %v910_v6  ;;  %v925_v22 = vld [vmem:[#allocation2 + $0x1c8] sm:$0xff]  ;;  %v927_v24 = vld [vmem:[#allocation2 + $0x1d8] sm:$0xff]  ;;  %v938_v47 = vld [vmem:[#allocation2 + $0x230] sm:$0xff] }
 0x340   :  { %v2166_v17 = vpack.c.bf16 %v921_v9, %v917_v8  ;;  %v929_v23 = vld [vmem:[#allocation2 + $0x1e8] sm:$0xff]  ;;  %v2304_v53 = vpack.c.bf16 %v938_v47, %v934_v46  ;;  %v2308_v2 = vpack.c.bf16 %v946_v59, %v942_v58  ;;  %v948_v3 = vld [vmem:[#allocation2 + $0x280] sm:$0xff]  ;;  %v950_v7 = vld [vmem:[#allocation2 + $0x290] sm:$0xff] }
 0x341   :  { %v941_v48 = vld [vmem:[#allocation2 + $0x248] sm:$0xff]  ;;  %v954_v8 = vld [vmem:[#allocation2 + $0x2b0] sm:$0xff]  ;;  %v984_v58 = vld [vmem:[#allocation2 + $0x3a0] sm:$0xff] }
 0x342   :  { %2149 = vmatpush1.bf16.msra.mxu1 %v2148_v25  ;;  %2277 = vmatpush1.bf16.msra.mxu0 %v2276_v26  ;;  %v931_v25 = vld [vmem:[#allocation2 + $0x1f8] sm:$0xff]  ;;  %v2168_v26 = vpack.c.bf16 %v920_v15, %v916_v14  ;;  %v957_v9 = vld [vmem:[#allocation2 + $0x2c8] sm:$0xff]  ;;  %v2312_v14 = vpack.c.bf16 %v954_v8, %v950_v7  ;;  %v956_v15 = vld [vmem:[#allocation2 + $0x2c0] sm:$0xff] }
 0x343   :  { %2151 = vmatprep.subr.bf16.mxu1 %v2150_v29  ;;  %2279 = vmatprep.subr.bf16.mxu0 %v2278_v30  ;;  %v928_v29 = vld [vmem:[#allocation2 + $0x1e0] sm:$0xff]  ;;  %v2170_v30 = vpack.c.bf16 %v929_v23, %v925_v22  ;;  %v2298_v31 = vpack.c.bf16 %v931_v25, %v927_v24  ;;  %v961_v10 = vld [vmem:[#allocation2 + $0x2e8] sm:$0xff]  ;;  %v962_v22 = vld [vmem:[#allocation2 + $0x2f0] sm:$0xff] }
 0x344   :  { %v965_v23 = vld [vmem:[#allocation2 + $0x308] sm:$0xff]  ;;  %v967_v25 = vld [vmem:[#allocation2 + $0x318] sm:$0xff]  ;;  %v974_v47 = vld [vmem:[#allocation2 + $0x350] sm:$0xff] }
 0x345   :  { %v969_v24 = vld [vmem:[#allocation2 + $0x328] sm:$0xff]  ;;  %v982_v59 = vld [vmem:[#allocation2 + $0x390] sm:$0xff] }
 0x346   :  { %2153 = vmatpush1.bf16.msra.mxu1 %v2152_v38  ;;  %2281 = vmatpush1.bf16.msra.mxu0 %v2280_v40  ;;  %v939_v38 = vld [vmem:[#allocation2 + $0x238] sm:$0xff]  ;;  %v2172_v40 = vpack.c.bf16 %v928_v29, %v924_v28  ;;  %v2316_v28 = vpack.c.bf16 %v962_v22, %v958_v21  ;;  %v964_v29 = vld [vmem:[#allocation2 + $0x300] sm:$0xff] }
 0x347   :  { %2155 = vmatprep.subr.bf16.mxu1 %v2154_v43  ;;  %2283 = vmatprep.subr.bf16.mxu0 %v2282_v44  ;;  %v936_v43 = vld [vmem:[#allocation2 + $0x220] sm:$0xff]  ;;  %v2174_v44 = vpack.c.bf16 %v937_v34, %v933_v33  ;;  %v2302_v45 = vpack.c.bf16 %v939_v38, %v935_v35  ;;  %v970_v33 = vld [vmem:[#allocation2 + $0x330] sm:$0xff]  ;;  %v973_v34 = vld [vmem:[#allocation2 + $0x348] sm:$0xff] }
 0x348   :  { %v977_v35 = vld [vmem:[#allocation2 + $0x368] sm:$0xff]  ;;  %v975_v38 = vld [vmem:[#allocation2 + $0x358] sm:$0xff]  ;;  %v996_v22 = vld [vmem:[#allocation2 + $0x400] sm:$0xff] }
 0x34a   :  { %2157 = vmatpush1.bf16.msra.mxu1 %v2156_v51  ;;  %2285 = vmatpush1.bf16.msra.mxu0 %v2284_v52  ;;  %v947_v51 = vld [vmem:[#allocation2 + $0x278] sm:$0xff]  ;;  %v2176_v52 = vpack.c.bf16 %v936_v43, %v932_v42  ;;  %v2320_v42 = vpack.c.bf16 %v970_v33, %v966_v36  ;;  %v972_v43 = vld [vmem:[#allocation2 + $0x340] sm:$0xff]  ;;  %v1009_v36 = vld [vmem:[#allocation2 + $0x468] sm:$0xff] }
 0x34b   :  { %2159 = vmatprep.subr.bf16.mxu1 %v2158_v55  ;;  %2287 = vmatprep.subr.bf16.mxu0 %v2286_v56  ;;  %v944_v55 = vld [vmem:[#allocation2 + $0x260] sm:$0xff]  ;;  %v2178_v56 = vpack.c.bf16 %v945_v49, %v941_v48  ;;  %v2306_v57 = vpack.c.bf16 %v947_v51, %v943_v50  ;;  %v978_v48 = vld [vmem:[#allocation2 + $0x370] sm:$0xff]  ;;  %v981_v49 = vld [vmem:[#allocation2 + $0x388] sm:$0xff] }
 0x34c   :  { %v985_v50 = vld [vmem:[#allocation2 + $0x3a8] sm:$0xff]  ;;  %v983_v51 = vld [vmem:[#allocation2 + $0x398] sm:$0xff] }
 0x34d   :  { %v1007_v33 = vld [vmem:[#allocation2 + $0x458] sm:$0xff] }
 0x34e   :  { %2161 = vmatpush1.bf16.msra.mxu1 %v2160_v63  ;;  %2289 = vmatpush1.bf16.msra.mxu0 %v2288_v1  ;;  %v955_v63 = vld [vmem:[#allocation2 + $0x2b8] sm:$0xff]  ;;  %v2180_v1 = vpack.c.bf16 %v944_v55, %v940_v54  ;;  %v2324_v54 = vpack.c.bf16 %v978_v48, %v974_v47  ;;  %v980_v55 = vld [vmem:[#allocation2 + $0x380] sm:$0xff] }
 0x34f   :  { %2163 = vmatprep.subr.bf16.mxu1 %v2162_v4  ;;  %2291 = vmatprep.subr.bf16.mxu0 %v2290_v5  ;;  %v952_v4 = vld [vmem:[#allocation2 + $0x2a0] sm:$0xff]  ;;  %v2182_v5 = vpack.c.bf16 %v953_v61, %v949_v60  ;;  %v2310_v6 = vpack.c.bf16 %v955_v63, %v951_v62  ;;  %v986_v60 = vld [vmem:[#allocation2 + $0x3b0] sm:$0xff]  ;;  %v2200_v61 = vpack.c.bf16 %v984_v58, %v980_v55  ;;  %v989_v63 = vld [vmem:[#allocation2 + $0x3c8] sm:$0xff] }
 0x350   :  { %v2328_v62 = vpack.c.bf16 %v986_v60, %v982_v59  ;;  %v1012_v55 = vld [vmem:[#allocation2 + $0x480] sm:$0xff]  ;;  %v1014_v59 = vld [vmem:[#allocation2 + $0x490] sm:$0xff] }
 0x351   :  { %v1018_v60 = vld [vmem:[#allocation2 + $0x4b0] sm:$0xff] }
 0x352   :  { %2165 = vmatpush1.bf16.msra.mxu1 %v2164_v12  ;;  %2293 = vmatpush1.bf16.msra.mxu0 %v2292_v13  ;;  %v963_v12 = vld [vmem:[#allocation2 + $0x2f8] sm:$0xff]  ;;  %v2184_v13 = vpack.c.bf16 %v952_v4, %v948_v3 }
 0x353   :  { %2167 = vmatprep.subr.bf16.mxu1 %v2166_v17  ;;  %2295 = vmatprep.subr.bf16.mxu0 %v2294_v19  ;;  %v960_v17 = vld [vmem:[#allocation2 + $0x2e0] sm:$0xff]  ;;  %v2186_v19 = vpack.c.bf16 %v961_v10, %v957_v9  ;;  %v2314_v20 = vpack.c.bf16 %v963_v12, %v959_v11  ;;  %v995_v4 = vld [vmem:[#allocation2 + $0x3f8] sm:$0xff]  ;;  %v990_v9 = vld [vmem:[#allocation2 + $0x3d0] sm:$0xff] }
 0x354   :  { %v994_v10 = vld [vmem:[#allocation2 + $0x3f0] sm:$0xff]  ;;  %v997_v12 = vld [vmem:[#allocation2 + $0x408] sm:$0xff] }
 0x355   :  { %v2332_v11 = vpack.c.bf16 %v994_v10, %v990_v9  ;;  %v1026_v9 = vld [vmem:[#allocation2 + $0x4f0] sm:$0xff]  ;;  %v1029_v10 = vld [vmem:[#allocation2 + $0x508] sm:$0xff] }
 0x356   :  { %2169 = vmatpush1.bf16.msra.mxu1 %v2168_v26  ;;  %2297 = vmatpush1.bf16.msra.mxu0 %v2296_v27  ;;  %v971_v26 = vld [vmem:[#allocation2 + $0x338] sm:$0xff]  ;;  %v2188_v27 = vpack.c.bf16 %v960_v17, %v956_v15 }
 0x357   :  { %2171 = vmatprep.subr.bf16.mxu1 %v2170_v30  ;;  %2299 = vmatprep.subr.bf16.mxu0 %v2298_v31  ;;  %v968_v30 = vld [vmem:[#allocation2 + $0x320] sm:$0xff]  ;;  %v2190_v31 = vpack.c.bf16 %v969_v24, %v965_v23  ;;  %v2318_v32 = vpack.c.bf16 %v971_v26, %v967_v25  ;;  %v1003_v17 = vld [vmem:[#allocation2 + $0x438] sm:$0xff]  ;;  %v998_v25 = vld [vmem:[#allocation2 + $0x410] sm:$0xff] }
 0x358   :  { %v1000_v24 = vld [vmem:[#allocation2 + $0x420] sm:$0xff]  ;;  %v1002_v26 = vld [vmem:[#allocation2 + $0x430] sm:$0xff] }
 0x35a   :  { %2173 = vmatpush1.bf16.msra.mxu1 %v2172_v40  ;;  %2301 = vmatpush1.bf16.msra.mxu0 %v2300_v41  ;;  %v979_v40 = vld [vmem:[#allocation2 + $0x378] sm:$0xff]  ;;  %v2192_v41 = vpack.c.bf16 %v968_v30, %v964_v29  ;;  %v1005_v29 = vld [vmem:[#allocation2 + $0x448] sm:$0xff] }
 0x35b   :  { %2175 = vmatprep.subr.bf16.mxu1 %v2174_v44  ;;  %2303 = vmatprep.subr.bf16.mxu0 %v2302_v45  ;;  %v976_v44 = vld [vmem:[#allocation2 + $0x360] sm:$0xff]  ;;  %v2194_v45 = vpack.c.bf16 %v977_v35, %v973_v34  ;;  %v2322_v46 = vpack.c.bf16 %v979_v40, %v975_v38  ;;  %v1011_v34 = vld [vmem:[#allocation2 + $0x478] sm:$0xff]  ;;  %v2208_v38 = vpack.c.bf16 %v1000_v24, %v996_v22  ;;  %v1034_v24 = vld [vmem:[#allocation2 + $0x530] sm:$0xff] }
 0x35c   :  { %v2336_v40 = vpack.c.bf16 %v1002_v26, %v998_v25  ;;  %v2210_v47 = vpack.c.bf16 %v1009_v36, %v1005_v29  ;;  %v2338_v48 = vpack.c.bf16 %v1011_v34, %v1007_v33  ;;  %v1037_v25 = vld [vmem:[#allocation2 + $0x548] sm:$0xff]  ;;  %v1043_v29 = vld [vmem:[#allocation2 + $0x578] sm:$0xff]  ;;  %v1040_v36 = vld [vmem:[#allocation2 + $0x560] sm:$0xff] }
 0x35d   :  { %v1041_v26 = vld [vmem:[#allocation2 + $0x568] sm:$0xff] }
 0x35e   :  { %2177 = vmatpush1.bf16.msra.mxu1 %v2176_v52  ;;  %2305 = vmatpush1.bf16.msra.mxu0 %v2304_v53  ;;  %v987_v52 = vld [vmem:[#allocation2 + $0x3b8] sm:$0xff]  ;;  %v2196_v53 = vpack.c.bf16 %v976_v44, %v972_v43  ;;  %v1006_v44 = vld [vmem:[#allocation2 + $0x450] sm:$0xff]  ;;  %v2226_v33 = vpack.c.bf16 %v1041_v26, %v1037_v25 }
 0x35f   :  { %2179 = vmatprep.subr.bf16.mxu1 %v2178_v56  ;;  %2307 = vmatprep.subr.bf16.mxu0 %v2306_v57  ;;  %v2198_v56 = vpack.c.bf16 %v985_v50, %v981_v49  ;;  %v2326_v57 = vpack.c.bf16 %v987_v52, %v983_v51  ;;  %v1017_v49 = vld [vmem:[#allocation2 + $0x4a8] sm:$0xff]  ;;  %v1015_v50 = vld [vmem:[#allocation2 + $0x498] sm:$0xff]  ;;  %v1070_v26 = vld [vmem:[#allocation2 + $0x650] sm:$0xff] }
 0x360   :  { %v1019_v51 = vld [vmem:[#allocation2 + $0x4b8] sm:$0xff] }
 0x361   :  { %v2342_v58 = vpack.c.bf16 %v1019_v51, %v1015_v50  ;;  %v1046_v50 = vld [vmem:[#allocation2 + $0x590] sm:$0xff] }
 0x362   :  { %2181 = vmatpush1.bf16.msra.mxu1 %v2180_v1  ;;  %2309 = vmatpush1.bf16.msra.mxu0 %v2308_v2  ;;  %v993_v1 = vld [vmem:[#allocation2 + $0x3e8] sm:$0xff]  ;;  %v991_v2 = vld [vmem:[#allocation2 + $0x3d8] sm:$0xff]  ;;  %v1050_v51 = vld [vmem:[#allocation2 + $0x5b0] sm:$0xff] }
 0x363   :  { %2183 = vmatprep.subr.bf16.mxu1 %v2182_v5  ;;  %2311 = vmatprep.subr.bf16.mxu0 %v2310_v6  ;;  %v2202_v3 = vpack.c.bf16 %v993_v1, %v989_v63  ;;  %v988_v5 = vld [vmem:[#allocation2 + $0x3c0] sm:$0xff]  ;;  %v2330_v7 = vpack.c.bf16 %v995_v4, %v991_v2  ;;  %v1023_v63 = vld [vmem:[#allocation2 + $0x4d8] sm:$0xff] }
 0x364   :  { %v992_v6 = vld [vmem:[#allocation2 + $0x3e0] sm:$0xff]  ;;  %v1027_v1 = vld [vmem:[#allocation2 + $0x4f8] sm:$0xff] }
 0x365   :  { %v2204_v8 = vpack.c.bf16 %v992_v6, %v988_v5  ;;  %v1020_v4 = vld [vmem:[#allocation2 + $0x4c0] sm:$0xff] }
 0x366   :  { %2185 = vmatpush1.bf16.msra.mxu1 %v2184_v13  ;;  %2313 = vmatpush1.bf16.msra.mxu0 %v2312_v14  ;;  %v1001_v13 = vld [vmem:[#allocation2 + $0x428] sm:$0xff]  ;;  %v999_v14 = vld [vmem:[#allocation2 + $0x418] sm:$0xff]  ;;  %v1024_v5 = vld [vmem:[#allocation2 + $0x4e0] sm:$0xff] }
 0x367   :  { %2187 = vmatprep.subr.bf16.mxu1 %v2186_v19  ;;  %2315 = vmatprep.subr.bf16.mxu0 %v2314_v20  ;;  %v2206_v15 = vpack.c.bf16 %v1001_v13, %v997_v12  ;;  %v2334_v19 = vpack.c.bf16 %v1003_v17, %v999_v14  ;;  %v3316_v20 = vld [vmem:[%s3572_s9] sm:$0xf]  ;;  %v1031_v12 = vld [vmem:[#allocation2 + $0x518] sm:$0xff]  ;;  %v2220_v14 = vpack.c.bf16 %v1024_v5, %v1020_v4 }
 0x368   :  { %v709_v21 = vrot.slane %v3316_v20, %v3090_v39  ;;  %v705_v23 = vrot.slane %v3316_v20, %v3084_v37  ;;  %v1035_v13 = vld [vmem:[#allocation2 + $0x538] sm:$0xff]  ;;  %v1028_v17 = vld [vmem:[#allocation2 + $0x500] sm:$0xff] }
 0x369   :  { %v2350_v22 = vpack.c.bf16 %v1035_v13, %v1031_v12  ;;  %v1067_v4 = vld [vmem:[#allocation2 + $0x638] sm:$0xff]  ;;  %v1066_v12 = vld [vmem:[#allocation2 + $0x630] sm:$0xff]  ;;  %v1069_v13 = vld [vmem:[#allocation2 + $0x648] sm:$0xff] }
 0x36a   :  { %2189 = vmatpush1.bf16.msra.mxu1 %v2188_v27  ;;  %2317 = vmatpush1.bf16.msra.mxu0 %v2316_v28 }
 0x36b   :  { %2191 = vmatprep.subr.bf16.mxu1 %v2190_v31  ;;  %2319 = vmatprep.subr.bf16.mxu0 %v2318_v32  ;;  %v717_v31 = vrot.slane %v3316_v20, %v3284_v18 }
 0x36e   :  { %2193 = vmatpush1.bf16.msra.mxu1 %v2192_v41  ;;  %2321 = vmatpush1.bf16.msra.mxu0 %v2320_v42  ;;  %v1004_v41 = vld [vmem:[#allocation2 + $0x440] sm:$0xff] }
 0x36f   :  { %2195 = vmatprep.subr.bf16.mxu1 %v2194_v45  ;;  %2323 = vmatprep.subr.bf16.mxu0 %v2322_v46  ;;  %v1008_v42 = vld [vmem:[#allocation2 + $0x460] sm:$0xff]  ;;  %v1010_v45 = vld [vmem:[#allocation2 + $0x470] sm:$0xff]  ;;  %v1013_v46 = vld [vmem:[#allocation2 + $0x488] sm:$0xff] }
 0x372   :  { %2197 = vmatpush1.bf16.msra.mxu1 %v2196_v53  ;;  %2325 = vmatpush1.bf16.msra.mxu0 %v2324_v54  ;;  %v2212_v53 = vpack.c.bf16 %v1008_v42, %v1004_v41  ;;  %v2340_v54 = vpack.c.bf16 %v1010_v45, %v1006_v44  ;;  %v1049_v41 = vld [vmem:[#allocation2 + $0x5a8] sm:$0xff]  ;;  %v1047_v42 = vld [vmem:[#allocation2 + $0x598] sm:$0xff] }
 0x373   :  { %2199 = vmatprep.subr.bf16.mxu1 %v2198_v56  ;;  %2327 = vmatprep.subr.bf16.mxu0 %v2326_v57  ;;  %v1016_v56 = vld [vmem:[#allocation2 + $0x4a0] sm:$0xff]  ;;  %v2214_v57 = vpack.c.bf16 %v1017_v49, %v1013_v46 }
 0x374   :  { %v2216_v2 = vpack.c.bf16 %v1016_v56, %v1012_v55  ;;  %v1044_v46 = vld [vmem:[#allocation2 + $0x580] sm:$0xff]  ;;  %v1059_v55 = vld [vmem:[#allocation2 + $0x5f8] sm:$0xff] }
 0x376   :  { %2201 = vmatpush1.bf16.msra.mxu1 %v2200_v61  ;;  %2329 = vmatpush1.bf16.msra.mxu0 %v2328_v62  ;;  %v1021_v61 = vld [vmem:[#allocation2 + $0x4c8] sm:$0xff] }
 0x377   :  { %2203 = vmatprep.subr.bf16.mxu1 %v2202_v3  ;;  %2331 = vmatprep.subr.bf16.mxu0 %v2330_v7  ;;  %v1025_v62 = vld [vmem:[#allocation2 + $0x4e8] sm:$0xff]  ;;  %v2344_v3 = vpack.c.bf16 %v1018_v60, %v1014_v59  ;;  %v2346_v7 = vpack.c.bf16 %v1027_v1, %v1023_v63  ;;  %v1056_v59 = vld [vmem:[#allocation2 + $0x5e0] sm:$0xff]  ;;  %v1058_v63 = vld [vmem:[#allocation2 + $0x5f0] sm:$0xff] }
 0x378   :  { %v2218_v6 = vpack.c.bf16 %v1025_v62, %v1021_v61  ;;  %v1054_v62 = vld [vmem:[#allocation2 + $0x5d0] sm:$0xff]  ;;  %v1061_v1 = vld [vmem:[#allocation2 + $0x608] sm:$0xff] }
 0x37a   :  { %2205 = vmatpush1.bf16.msra.mxu1 %v2204_v8  ;;  %2333 = vmatpush1.bf16.msra.mxu0 %v2332_v11  ;;  %v1022_v8 = vld [vmem:[#allocation2 + $0x4d0] sm:$0xff]  ;;  %v1033_v11 = vld [vmem:[#allocation2 + $0x528] sm:$0xff] }
 0x37b   :  { %2207 = vmatprep.subr.bf16.mxu1 %v2206_v15  ;;  %2335 = vmatprep.subr.bf16.mxu0 %v2334_v19  ;;  %v2348_v15 = vpack.c.bf16 %v1026_v9, %v1022_v8  ;;  %v1032_v19 = vld [vmem:[#allocation2 + $0x520] sm:$0xff] }
 0x37c   :  { %v1064_v8 = vld [vmem:[#allocation2 + $0x620] sm:$0xff] }
 0x410   :  { %v792_v27 = vpop.f32.mrb[6].mxu0  ;;  %v3322_v28 = vpop.f32.mrb[4].mxu1 }
 0x411   :  { %v794_v30 = vpop.f32.mrb[7].mxu0  ;;  %v865_v32 = vpop.f32.mrb[5].mxu1  ;;  %v793_v43 = vadd.f32 %v792_v27, %v705_v23  ;;  %v1030_v23 = vld [vmem:[#allocation2 + $0x510] sm:$0xff]  ;;  %v1039_v27 = vld [vmem:[#allocation2 + $0x558] sm:$0xff] }
 0x412   :  { %v795_v35 = vadd.f32 %v794_v30, %v709_v21  ;;  %v866_v52 = vadd.f32 %v865_v32, %v717_v31  ;;  %v2222_v21 = vpack.c.bf16 %v1033_v11, %v1029_v10  ;;  %v2224_v30 = vpack.c.bf16 %v1032_v19, %v1028_v17  ;;  %v1036_v32 = vld [vmem:[#allocation2 + $0x540] sm:$0xff]  ;;  %v1062_v11 = vld [vmem:[#allocation2 + $0x610] sm:$0xff]  ;;  %v1075_v17 = vld [vmem:[#allocation2 + $0x678] sm:$0xff] }
 0x413   :  { %v2352_v31 = vpack.c.bf16 %v1034_v24, %v1030_v23  ;;  %v2354_v34 = vpack.c.bf16 %v1043_v29, %v1039_v27  ;;  %v2228_v44 = vpack.c.bf16 %v1040_v36, %v1036_v32  ;;  %v1072_v23 = vld [vmem:[#allocation2 + $0x660] sm:$0xff]  ;;  %v1074_v27 = vld [vmem:[#allocation2 + $0x670] sm:$0xff]  ;;  %v1077_v29 = vld [vmem:[#allocation2 + $0x688] sm:$0xff] }
 0x414   :  { %1210 = vmatprep.mubr.f32.mxu1 %v795_v35  ;;  %1352 = vmatprep.mubr.f32.mxu0 %v795_v35  ;;  %v1038_v35 = vld [vmem:[#allocation2 + $0x550] sm:$0xff]  ;;  %v1083_v32 = vld [vmem:[#allocation2 + $0x6b8] sm:$0xff] }
 0x415   :  { %1211 = vmatmul.mubr.f32.vlgmr.msra.gmra.mrb[6].mxu1 %v793_v43  ;;  %1353 = vmatmul.mubr.f32.vlgmr.msra.gmra.mrb[8].mxu0 %v793_v43  ;;  %v1051_v43 = vld [vmem:[#allocation2 + $0x5b8] sm:$0xff] }
 0x416   :  { %2209 = vmatpush1.bf16.msra.mxu1 %v2208_v38  ;;  %2337 = vmatpush1.bf16.msra.mxu0 %v2336_v40  ;;  %v1042_v38 = vld [vmem:[#allocation2 + $0x570] sm:$0xff]  ;;  %v1045_v40 = vld [vmem:[#allocation2 + $0x588] sm:$0xff]  ;;  %v2358_v49 = vpack.c.bf16 %v1051_v43, %v1047_v42 }
 0x417   :  { %1281 = vmatprep.mubr.f32.mxu1 %v866_v52  ;;  %1423 = vmatprep.mubr.f32.mxu0 %v866_v52  ;;  %v2356_v45 = vpack.c.bf16 %v1042_v38, %v1038_v35  ;;  %v1053_v52 = vld [vmem:[#allocation2 + $0x5c8] sm:$0xff]  ;;  %v1080_v35 = vld [vmem:[#allocation2 + $0x6a0] sm:$0xff]  ;;  %v1082_v42 = vld [vmem:[#allocation2 + $0x6b0] sm:$0xff] }
 0x418   :  { %2211 = vmatprep.subr.bf16.mxu1 %v2210_v47  ;;  %2339 = vmatprep.subr.bf16.mxu0 %v2338_v48  ;;  %v1048_v47 = vld [vmem:[#allocation2 + $0x5a0] sm:$0xff]  ;;  %v2230_v48 = vpack.c.bf16 %v1049_v41, %v1045_v40  ;;  %v1078_v41 = vld [vmem:[#allocation2 + $0x690] sm:$0xff]  ;;  %v1085_v43 = vld [vmem:[#allocation2 + $0x6c8] sm:$0xff] }
 0x419   :  { %v2232_v56 = vpack.c.bf16 %v1048_v47, %v1044_v46  ;;  %v1091_v46 = vld [vmem:[#allocation2 + $0x6f8] sm:$0xff] }
 0x41a   :  { %2213 = vmatpush1.bf16.msra.mxu1 %v2212_v53  ;;  %2341 = vmatpush1.bf16.msra.mxu0 %v2340_v54  ;;  %v1057_v53 = vld [vmem:[#allocation2 + $0x5e8] sm:$0xff]  ;;  %v1055_v54 = vld [vmem:[#allocation2 + $0x5d8] sm:$0xff] }
 0x41b   :  { %2215 = vmatprep.subr.bf16.mxu1 %v2214_v57  ;;  %2343 = vmatprep.subr.bf16.mxu0 %v2342_v58  ;;  %v2360_v57 = vpack.c.bf16 %v1050_v51, %v1046_v50  ;;  %v1052_v58 = vld [vmem:[#allocation2 + $0x5c0] sm:$0xff]  ;;  %v2234_v60 = vpack.c.bf16 %v1057_v53, %v1053_v52  ;;  %v2362_v61 = vpack.c.bf16 %v1059_v55, %v1055_v54  ;;  %v1086_v53 = vld [vmem:[#allocation2 + $0x6d0] sm:$0xff]  ;;  %v1093_v55 = vld [vmem:[#allocation2 + $0x708] sm:$0xff] }
 0x41c   :  { %v2236_v5 = vpack.c.bf16 %v1056_v59, %v1052_v58  ;;  %v1088_v50 = vld [vmem:[#allocation2 + $0x6e0] sm:$0xff]  ;;  %v1090_v54 = vld [vmem:[#allocation2 + $0x6f0] sm:$0xff]  ;;  %v1099_v58 = vld [vmem:[#allocation2 + $0x738] sm:$0xff] }
 0x41e   :  { %2217 = vmatpush1.bf16.msra.mxu1 %v2216_v2  ;;  %2345 = vmatpush1.bf16.msra.mxu0 %v2344_v3  ;;  %v1065_v2 = vld [vmem:[#allocation2 + $0x628] sm:$0xff]  ;;  %v1063_v3 = vld [vmem:[#allocation2 + $0x618] sm:$0xff] }
 0x41f   :  { %2219 = vmatprep.subr.bf16.mxu1 %v2218_v6  ;;  %2347 = vmatprep.subr.bf16.mxu0 %v2346_v7  ;;  %v2364_v6 = vpack.c.bf16 %v1058_v63, %v1054_v62  ;;  %v1060_v7 = vld [vmem:[#allocation2 + $0x600] sm:$0xff]  ;;  %v2238_v9 = vpack.c.bf16 %v1065_v2, %v1061_v1  ;;  %v2366_v10 = vpack.c.bf16 %v1067_v4, %v1063_v3  ;;  %v1094_v2 = vld [vmem:[#allocation2 + $0x710] sm:$0xff]  ;;  %v1101_v4 = vld [vmem:[#allocation2 + $0x748] sm:$0xff] }
 0x420   :  { %v2240_v19 = vpack.c.bf16 %v1064_v8, %v1060_v7  ;;  %v1096_v62 = vld [vmem:[#allocation2 + $0x720] sm:$0xff]  ;;  %v1098_v3 = vld [vmem:[#allocation2 + $0x730] sm:$0xff]  ;;  %v1107_v7 = vld [vmem:[#allocation2 + $0x778] sm:$0xff] }
 0x422   :  { %2221 = vmatpush1.bf16.msra.mxu1 %v2220_v14  ;;  %2349 = vmatpush1.bf16.msra.mxu0 %v2348_v15  ;;  %v1073_v14 = vld [vmem:[#allocation2 + $0x668] sm:$0xff]  ;;  %v1071_v15 = vld [vmem:[#allocation2 + $0x658] sm:$0xff] }
 0x423   :  { %2223 = vmatprep.subr.bf16.mxu1 %v2222_v21  ;;  %2351 = vmatprep.subr.bf16.mxu0 %v2350_v22  ;;  %v2368_v21 = vpack.c.bf16 %v1066_v12, %v1062_v11  ;;  %v1068_v22 = vld [vmem:[#allocation2 + $0x640] sm:$0xff]  ;;  %v2242_v24 = vpack.c.bf16 %v1073_v14, %v1069_v13  ;;  %v2370_v25 = vpack.c.bf16 %v1075_v17, %v1071_v15  ;;  %v1102_v14 = vld [vmem:[#allocation2 + $0x750] sm:$0xff]  ;;  %v1109_v17 = vld [vmem:[#allocation2 + $0x788] sm:$0xff] }
 0x424   :  { %v2244_v36 = vpack.c.bf16 %v1072_v23, %v1068_v22  ;;  %v1104_v11 = vld [vmem:[#allocation2 + $0x760] sm:$0xff]  ;;  %v1106_v15 = vld [vmem:[#allocation2 + $0x770] sm:$0xff]  ;;  %v1115_v22 = vld [vmem:[#allocation2 + $0x7b8] sm:$0xff] }
 0x426   :  { %2225 = vmatpush1.bf16.msra.mxu1 %v2224_v30  ;;  %2353 = vmatpush1.bf16.msra.mxu0 %v2352_v31  ;;  %v1081_v30 = vld [vmem:[#allocation2 + $0x6a8] sm:$0xff]  ;;  %v1079_v31 = vld [vmem:[#allocation2 + $0x698] sm:$0xff] }
 0x427   :  { %2227 = vmatprep.subr.bf16.mxu1 %v2226_v33  ;;  %2355 = vmatprep.subr.bf16.mxu0 %v2354_v34  ;;  %v2372_v33 = vpack.c.bf16 %v1074_v27, %v1070_v26  ;;  %v1076_v34 = vld [vmem:[#allocation2 + $0x680] sm:$0xff]  ;;  %v2246_v38 = vpack.c.bf16 %v1081_v30, %v1077_v29  ;;  %v2374_v40 = vpack.c.bf16 %v1083_v32, %v1079_v31  ;;  %v1110_v30 = vld [vmem:[#allocation2 + $0x790] sm:$0xff]  ;;  %v1117_v32 = vld [vmem:[#allocation2 + $0x7c8] sm:$0xff] }
 0x428   :  { %v2248_v47 = vpack.c.bf16 %v1080_v35, %v1076_v34  ;;  %v1112_v26 = vld [vmem:[#allocation2 + $0x7a0] sm:$0xff]  ;;  %v1114_v31 = vld [vmem:[#allocation2 + $0x7b0] sm:$0xff]  ;;  %v1123_v34 = vld [vmem:[#allocation2 + $0x7f8] sm:$0xff] }
 0x42a   :  { %2229 = vmatpush1.bf16.msra.mxu1 %v2228_v44  ;;  %2357 = vmatpush1.bf16.msra.mxu0 %v2356_v45  ;;  %v1089_v44 = vld [vmem:[#allocation2 + $0x6e8] sm:$0xff]  ;;  %v1087_v45 = vld [vmem:[#allocation2 + $0x6d8] sm:$0xff] }
 0x42b   :  { %2231 = vmatprep.subr.bf16.mxu1 %v2230_v48  ;;  %2359 = vmatprep.subr.bf16.mxu0 %v2358_v49  ;;  %v2376_v48 = vpack.c.bf16 %v1082_v42, %v1078_v41  ;;  %v1084_v49 = vld [vmem:[#allocation2 + $0x6c0] sm:$0xff]  ;;  %v2250_v51 = vpack.c.bf16 %v1089_v44, %v1085_v43  ;;  %v2378_v52 = vpack.c.bf16 %v1091_v46, %v1087_v45  ;;  %v1118_v44 = vld [vmem:[#allocation2 + $0x7d0] sm:$0xff] }
 0x42c   :  { %v2252_v59 = vpack.c.bf16 %v1088_v50, %v1084_v49  ;;  %v1120_v41 = vld [vmem:[#allocation2 + $0x7e0] sm:$0xff]  ;;  %v1122_v45 = vld [vmem:[#allocation2 + $0x7f0] sm:$0xff]  ;;  %v1483_v49 = vld [vmem:[%s3575_s12 + $0x188] sm:$0xff] }
 0x42d   :  { %v1450_v46 = vld [vmem:[%s3575_s12 + $0x80] sm:$0xff] }
 0x42e   :  { %2233 = vmatpush1.bf16.msra.mxu1 %v2232_v56  ;;  %2361 = vmatpush1.bf16.msra.mxu0 %v2360_v57  ;;  %v1097_v56 = vld [vmem:[#allocation2 + $0x728] sm:$0xff]  ;;  %v1095_v57 = vld [vmem:[#allocation2 + $0x718] sm:$0xff] }
 0x42f   :  { %2235 = vmatprep.subr.bf16.mxu1 %v2234_v60  ;;  %2363 = vmatprep.subr.bf16.mxu0 %v2362_v61  ;;  %v2380_v60 = vpack.c.bf16 %v1090_v54, %v1086_v53  ;;  %v1092_v61 = vld [vmem:[#allocation2 + $0x700] sm:$0xff]  ;;  %v2254_v63 = vpack.c.bf16 %v1097_v56, %v1093_v55  ;;  %v2382_v1 = vpack.c.bf16 %v1099_v58, %v1095_v57  ;;  %v1435_v53 = vld [vmem:[%s3575_s12 + $0x8] sm:$0xff] }
 0x430   :  { %v2256_v8 = vpack.c.bf16 %v1096_v62, %v1092_v61  ;;  %v713_v54 = vrot.slane %v3316_v20, %v3278_v16  ;;  %v1466_v57 = vld [vmem:[%s3575_s12 + $0x100] sm:$0xff]  ;;  %v1467_v58 = vld [vmem:[%s3575_s12 + $0x108] sm:$0xff]  ;;  %v1453_v20 = vld [vmem:[%s3575_s12 + $0x98] sm:$0xff] }
 0x431   :  { %v1485_v61 = vld [vmem:[%s3575_s12 + $0x198] sm:$0xff] }
 0x432   :  { %2237 = vmatpush1.bf16.msra.mxu1 %v2236_v5  ;;  %2365 = vmatpush1.bf16.msra.mxu0 %v2364_v6  ;;  %v1105_v5 = vld [vmem:[#allocation2 + $0x768] sm:$0xff]  ;;  %v1103_v6 = vld [vmem:[#allocation2 + $0x758] sm:$0xff] }
 0x433   :  { %2239 = vmatprep.subr.bf16.mxu1 %v2238_v9  ;;  %2367 = vmatprep.subr.bf16.mxu0 %v2366_v10  ;;  %v2384_v9 = vpack.c.bf16 %v1098_v3, %v1094_v2  ;;  %v1100_v10 = vld [vmem:[#allocation2 + $0x740] sm:$0xff]  ;;  %v2258_v12 = vpack.c.bf16 %v1105_v5, %v1101_v4  ;;  %v2386_v13 = vpack.c.bf16 %v1107_v7, %v1103_v6  ;;  %v1437_v2 = vld [vmem:[%s3575_s12 + $0x18] sm:$0xff]  ;;  %v1468_v6 = vld [vmem:[%s3575_s12 + $0x110] sm:$0xff] }
 0x434   :  { %v2260_v23 = vpack.c.bf16 %v1104_v11, %v1100_v10  ;;  %v864_v3 = vadd.f32 %v3322_v28, %v713_v54  ;;  %v1469_v7 = vld [vmem:[%s3575_s12 + $0x118] sm:$0xff]  ;;  %v1455_v28 = vld [vmem:[%s3575_s12 + $0xa8] sm:$0xff] }
 0x435   :  { %v1487_v10 = vld [vmem:[%s3575_s12 + $0x1a8] sm:$0xff] }
 0x436   :  { %2241 = vmatpush1.bf16.msra.mxu1 %v2240_v19  ;;  %2369 = vmatpush1.bf16.msra.mxu0 %v2368_v21  ;;  %v1113_v19 = vld [vmem:[#allocation2 + $0x7a8] sm:$0xff]  ;;  %v1111_v21 = vld [vmem:[#allocation2 + $0x798] sm:$0xff] }
 0x437   :  { %2243 = vmatprep.subr.bf16.mxu1 %v2242_v24  ;;  %2371 = vmatprep.subr.bf16.mxu0 %v2370_v25  ;;  %v2388_v24 = vpack.c.bf16 %v1106_v15, %v1102_v14  ;;  %v1108_v25 = vld [vmem:[#allocation2 + $0x780] sm:$0xff]  ;;  %v2262_v27 = vpack.c.bf16 %v1113_v19, %v1109_v17  ;;  %v2390_v29 = vpack.c.bf16 %v1115_v22, %v1111_v21  ;;  %v1439_v14 = vld [vmem:[%s3575_s12 + $0x28] sm:$0xff]  ;;  %v1456_v22 = vld [vmem:[%s3575_s12 + $0xb0] sm:$0xff] }
 0x438   :  { %v2264_v35 = vpack.c.bf16 %v1112_v26, %v1108_v25  ;;  %v1470_v19 = vld [vmem:[%s3575_s12 + $0x120] sm:$0xff]  ;;  %v1471_v21 = vld [vmem:[%s3575_s12 + $0x128] sm:$0xff]  ;;  %v1489_v25 = vld [vmem:[%s3575_s12 + $0x1b8] sm:$0xff] }
 0x43a   :  { %2245 = vmatpush1.bf16.msra.mxu1 %v2244_v36  ;;  %2373 = vmatpush1.bf16.msra.mxu0 %v2372_v33  ;;  %v1121_v36 = vld [vmem:[#allocation2 + $0x7e8] sm:$0xff]  ;;  %v1119_v33 = vld [vmem:[#allocation2 + $0x7d8] sm:$0xff] }
 0x43b   :  { %2247 = vmatprep.subr.bf16.mxu1 %v2246_v38  ;;  %2375 = vmatprep.subr.bf16.mxu0 %v2374_v40  ;;  %v2392_v38 = vpack.c.bf16 %v1114_v31, %v1110_v30  ;;  %v1116_v40 = vld [vmem:[#allocation2 + $0x7c0] sm:$0xff]  ;;  %v2266_v42 = vpack.c.bf16 %v1121_v36, %v1117_v32  ;;  %v2394_v43 = vpack.c.bf16 %v1123_v34, %v1119_v33  ;;  %v1441_v30 = vld [vmem:[%s3575_s12 + $0x38] sm:$0xff]  ;;  %v1472_v36 = vld [vmem:[%s3575_s12 + $0x130] sm:$0xff] }
 0x43c   :  { %v2268_v50 = vpack.c.bf16 %v1120_v41, %v1116_v40  ;;  %v1473_v33 = vld [vmem:[%s3575_s12 + $0x138] sm:$0xff]  ;;  %v1458_v34 = vld [vmem:[%s3575_s12 + $0xc0] sm:$0xff]  ;;  %v1491_v40 = vld [vmem:[%s3575_s12 + $0x1c8] sm:$0xff] }
 0x43e   :  { %2249 = vmatpush1.bf16.msra.mxu1 %v2248_v47  ;;  %2377 = vmatpush1.bf16.msra.mxu0 %v2376_v48  ;;  %v1451_v47 = vld [vmem:[%s3575_s12 + $0x88] sm:$0xff]  ;;  %v1482_v48 = vld [vmem:[%s3575_s12 + $0x180] sm:$0xff] }
 0x43f   :  { %2251 = vmatprep.subr.bf16.mxu1 %v2250_v51  ;;  %2379 = vmatprep.subr.bf16.mxu0 %v2378_v52  ;;  %v2396_v51 = vpack.c.bf16 %v1122_v45, %v1118_v44  ;;  %v1434_v52 = vld [vmem:[%s3575_s12] sm:$0xff]  ;;  %v2398_v55 = vpack.c.bf16 %v1451_v47, %v1450_v46  ;;  %v2430_v56 = vpack.c.bf16 %v1483_v49, %v1482_v48  ;;  %v1443_v44 = vld [vmem:[%s3575_s12 + $0x48] sm:$0xff]  ;;  %v1460_v49 = vld [vmem:[%s3575_s12 + $0xd0] sm:$0xff] }
 0x440   :  { %v2400_v62 = vpack.c.bf16 %v1435_v53, %v1434_v52  ;;  %v1474_v47 = vld [vmem:[%s3575_s12 + $0x140] sm:$0xff]  ;;  %v1475_v48 = vld [vmem:[%s3575_s12 + $0x148] sm:$0xff]  ;;  %v1493_v52 = vld [vmem:[%s3575_s12 + $0x1d8] sm:$0xff] }
 0x441   :  { %v2448_v54 = vpack.c.bf16 %v1475_v48, %v1474_v47  ;;  %v1650_v48 = vld [vmem:[%s3577_s14 + $0x20] sm:$0xff] }
 0x442   :  { %2253 = vmatpush1.bf16.msra.mxu1 %v2252_v59  ;;  %2381 = vmatpush1.bf16.msra.mxu0 %v2380_v60  ;;  %v1452_v59 = vld [vmem:[%s3575_s12 + $0x90] sm:$0xff] }
 0x443   :  { %2255 = vmatprep.subr.bf16.mxu1 %v2254_v63  ;;  %2383 = vmatprep.subr.bf16.mxu0 %v2382_v1  ;;  %v1484_v60 = vld [vmem:[%s3575_s12 + $0x190] sm:$0xff]  ;;  %v2432_v63 = vpack.c.bf16 %v1467_v58, %v1466_v57  ;;  %v2402_v4 = vpack.c.bf16 %v1453_v20, %v1452_v59  ;;  %v1477_v20 = vld [vmem:[%s3575_s12 + $0x158] sm:$0xff] }
 0x444   :  { %v1436_v1 = vld [vmem:[%s3575_s12 + $0x10] sm:$0xff]  ;;  %v2434_v5 = vpack.c.bf16 %v1485_v61, %v1484_v60  ;;  %v1462_v60 = vld [vmem:[%s3575_s12 + $0xe0] sm:$0xff]  ;;  %v1463_v61 = vld [vmem:[%s3575_s12 + $0xe8] sm:$0xff] }
 0x445   :  { %v2404_v11 = vpack.c.bf16 %v1437_v2, %v1436_v1  ;;  %v1476_v59 = vld [vmem:[%s3575_s12 + $0x150] sm:$0xff] }
 0x446   :  { %2257 = vmatpush1.bf16.msra.mxu1 %v2256_v8  ;;  %2385 = vmatpush1.bf16.msra.mxu0 %v2384_v9  ;;  %v1454_v8 = vld [vmem:[%s3575_s12 + $0xa0] sm:$0xff]  ;;  %v2452_v2 = vpack.c.bf16 %v1477_v20, %v1476_v59 }
 0x447   :  { %2259 = vmatprep.subr.bf16.mxu1 %v2258_v12  ;;  %2387 = vmatprep.subr.bf16.mxu0 %v2386_v13  ;;  %v1486_v9 = vld [vmem:[%s3575_s12 + $0x1a0] sm:$0xff]  ;;  %v2436_v12 = vpack.c.bf16 %v1469_v7, %v1468_v6  ;;  %v2406_v15 = vpack.c.bf16 %v1455_v28, %v1454_v8  ;;  %v1447_v6 = vld [vmem:[%s3575_s12 + $0x68] sm:$0xff] }
 0x448   :  { %v1438_v13 = vld [vmem:[%s3575_s12 + $0x20] sm:$0xff]  ;;  %v2438_v17 = vpack.c.bf16 %v1487_v10, %v1486_v9  ;;  %v1479_v28 = vld [vmem:[%s3575_s12 + $0x168] sm:$0xff]  ;;  %v1464_v10 = vld [vmem:[%s3575_s12 + $0xf0] sm:$0xff] }
 0x449   :  { %v2408_v26 = vpack.c.bf16 %v1439_v14, %v1438_v13  ;;  %v1478_v7 = vld [vmem:[%s3575_s12 + $0x160] sm:$0xff]  ;;  %v1497_v14 = vld [vmem:[%s3575_s12 + $0x1f8] sm:$0xff] }
 0x44a   :  { %2261 = vmatpush1.bf16.msra.mxu1 %v2260_v23  ;;  %2389 = vmatpush1.bf16.msra.mxu0 %v2388_v24  ;;  %v1457_v23 = vld [vmem:[%s3575_s12 + $0xb8] sm:$0xff]  ;;  %v1488_v24 = vld [vmem:[%s3575_s12 + $0x1b0] sm:$0xff]  ;;  %v2456_v9 = vpack.c.bf16 %v1479_v28, %v1478_v7 }
 0x44b   :  { %2263 = vmatprep.subr.bf16.mxu1 %v2262_v27  ;;  %2391 = vmatprep.subr.bf16.mxu0 %v2390_v29  ;;  %v2440_v27 = vpack.c.bf16 %v1471_v21, %v1470_v19  ;;  %v1440_v29 = vld [vmem:[%s3575_s12 + $0x30] sm:$0xff]  ;;  %v2410_v31 = vpack.c.bf16 %v1457_v23, %v1456_v22  ;;  %v2442_v32 = vpack.c.bf16 %v1489_v25, %v1488_v24  ;;  %v1481_v23 = vld [vmem:[%s3575_s12 + $0x178] sm:$0xff]  ;;  %v2528_v25 = vmov 0.0|0.0  }
 0x44c   :  { %v2412_v41 = vpack.c.bf16 %v1441_v30, %v1440_v29  ;;  %v1480_v22 = vld [vmem:[%s3575_s12 + $0x170] sm:$0xff] }
 0x44d   :  { %v2460_v24 = vpack.c.bf16 %v1481_v23, %v1480_v22 }
 0x44e   :  { %2265 = vmatpush1.bf16.msra.mxu1 %v2264_v35  ;;  %2393 = vmatpush1.bf16.msra.mxu0 %v2392_v38  ;;  %v1459_v35 = vld [vmem:[%s3575_s12 + $0xc8] sm:$0xff]  ;;  %v1490_v38 = vld [vmem:[%s3575_s12 + $0x1c0] sm:$0xff] }
 0x44f   :  { %2267 = vmatprep.subr.bf16.mxu1 %v2266_v42  ;;  %2395 = vmatprep.subr.bf16.mxu0 %v2394_v43  ;;  %v2444_v42 = vpack.c.bf16 %v1473_v33, %v1472_v36  ;;  %v1442_v43 = vld [vmem:[%s3575_s12 + $0x40] sm:$0xff]  ;;  %v2414_v45 = vpack.c.bf16 %v1459_v35, %v1458_v34  ;;  %v2446_v46 = vpack.c.bf16 %v1491_v40, %v1490_v38 }
 0x450   :  { %v2416_v53 = vpack.c.bf16 %v1443_v44, %v1442_v43  ;;  %v1646_v40 = vld [vmem:[%s3577_s14] sm:$0xff] }
 0x452   :  { %2269 = vmatpush1.bf16.msra.mxu1 %v2268_v50  ;;  %2397 = vmatpush1.bf16.msra.mxu0 %v2396_v51  ;;  %v1461_v50 = vld [vmem:[%s3575_s12 + $0xd8] sm:$0xff]  ;;  %v1492_v51 = vld [vmem:[%s3575_s12 + $0x1d0] sm:$0xff] }
 0x453   :  { %2399 = vmatprep.subr.bf16.mxu1 %v2398_v55  ;;  %2431 = vmatprep.subr.bf16.mxu0 %v2430_v56  ;;  %v1444_v55 = vld [vmem:[%s3575_s12 + $0x50] sm:$0xff]  ;;  %v1445_v56 = vld [vmem:[%s3575_s12 + $0x58] sm:$0xff]  ;;  %v2418_v57 = vpack.c.bf16 %v1461_v50, %v1460_v49  ;;  %v2450_v58 = vpack.c.bf16 %v1493_v52, %v1492_v51  ;;  %v1651_v49 = vld [vmem:[%s3577_s14 + $0x28] sm:$0xff] }
 0x454   :  { %v2420_v1 = vpack.c.bf16 %v1445_v56, %v1444_v55  ;;  %v2469_v50 = vpack.c.bf16 %v1651_v49, %v1650_v48  ;;  %v1652_v51 = vld [vmem:[%s3577_s14 + $0x30] sm:$0xff]  ;;  %v1653_v52 = vld [vmem:[%s3577_s14 + $0x38] sm:$0xff]  ;;  %v1763_v56 = vld [vmem:[%s3576_s13] ss:$0 sm:$0xff] }
 0x455   :  { %1282 = vmatmul.mubr.f32.vlgmr.msra.gmra.mrb[6].mxu1 %v864_v3  ;;  %1424 = vmatmul.mubr.f32.vlgmr.msra.gmra.mrb[8].mxu0 %v864_v3  ;;  %v2422_v3 = vpack.c.bf16 %v1463_v61, %v1462_v60 }
 0x456   :  { %2401 = vmatpush3.bf16.msra.mxu1 %v2400_v62  ;;  %2433 = vmatpush3.bf16.msra.mxu0 %v2432_v63  ;;  %v1494_v62 = vld [vmem:[%s3575_s12 + $0x1e0] sm:$0xff]  ;;  %v1495_v63 = vld [vmem:[%s3575_s12 + $0x1e8] sm:$0xff] }
 0x457   :  { %2403 = vmatprep.subr.bf16.mxu1 %v2402_v4  ;;  %2435 = vmatprep.subr.bf16.mxu0 %v2434_v5  ;;  %v2454_v4 = vpack.c.bf16 %v1495_v63, %v1494_v62  ;;  %v1446_v5 = vld [vmem:[%s3575_s12 + $0x60] sm:$0xff] }
 0x458   :  { %v2424_v8 = vpack.c.bf16 %v1447_v6, %v1446_v5  ;;  %v1764_v63 = vld [vmem:[%s3578_s15] ss:$0 sm:$0xff] }
 0x45a   :  { %2405 = vmatpush3.bf16.msra.mxu1 %v2404_v11  ;;  %2437 = vmatpush3.bf16.msra.mxu0 %v2436_v12  ;;  %v1465_v11 = vld [vmem:[%s3575_s12 + $0xf8] sm:$0xff]  ;;  %v1496_v12 = vld [vmem:[%s3575_s12 + $0x1f0] sm:$0xff] }
 0x45b   :  { %2407 = vmatprep.subr.bf16.mxu1 %v2406_v15  ;;  %2439 = vmatprep.subr.bf16.mxu0 %v2438_v17  ;;  %v2426_v13 = vpack.c.bf16 %v1465_v11, %v1464_v10  ;;  %v1448_v15 = vld [vmem:[%s3575_s12 + $0x70] sm:$0xff]  ;;  %v1449_v17 = vld [vmem:[%s3575_s12 + $0x78] sm:$0xff]  ;;  %v2458_v19 = vpack.c.bf16 %v1497_v14, %v1496_v12 }
 0x45c   :  { %v2428_v21 = vpack.c.bf16 %v1449_v17, %v1448_v15 }
 0x45e   :  { %2409 = vmatpush3.bf16.msra.mxu1 %v2408_v26  ;;  %2441 = vmatpush3.bf16.msra.mxu0 %v2440_v27  ;;  %v1124_v26 = vld [vmem:[%s3574_s11] sm:$0xf] }
 0x45f   :  { %2411 = vmatprep.subr.bf16.mxu1 %v2410_v31  ;;  %2443 = vmatprep.subr.bf16.mxu0 %v2442_v32  ;;  %v1129_v27 = vrot.slane %v1124_v26, %v3084_v37  ;;  %v1137_v29 = vrot.slane %v1124_v26, %v3278_v16  ;;  %v1133_v30 = vrot.slane %v1124_v26, %v3090_v39  ;;  %v1647_v37 = vld [vmem:[%s3577_s14 + $0x8] sm:$0xff] }
 0x460   :  { %v1141_v31 = vrot.slane %v1124_v26, %v3284_v18  ;;  %v2463_v43 = vpack.c.bf16 %v1647_v37, %v1646_v40 }
 0x462   :  { %2413 = vmatpush3.bf16.msra.mxu1 %v2412_v41  ;;  %2445 = vmatpush3.bf16.msra.mxu0 %v2444_v42 }
 0x463   :  { %2415 = vmatprep.subr.bf16.mxu1 %v2414_v45  ;;  %2447 = vmatprep.subr.bf16.mxu0 %v2446_v46  ;;  %v1648_v45 = vld [vmem:[%s3577_s14 + $0x10] sm:$0xff]  ;;  %v1649_v46 = vld [vmem:[%s3577_s14 + $0x18] sm:$0xff] }
 0x464   :  { %v2466_v47 = vpack.c.bf16 %v1649_v46, %v1648_v45 }
 0x466   :  { %2417 = vmatpush3.bf16.msra.mxu1 %v2416_v53  ;;  %2449 = vmatpush3.bf16.msra.mxu0 %v2448_v54  ;;  %v2472_v53 = vpack.c.bf16 %v1653_v52, %v1652_v51 }
 0x467   :  { %2419 = vmatprep.subr.bf16.mxu1 %v2418_v57  ;;  %2451 = vmatprep.subr.bf16.mxu0 %v2450_v58 }
 0x46a   :  { %2421 = vmatpush3.bf16.msra.mxu1 %v2420_v1  ;;  %2453 = vmatpush3.bf16.msra.mxu0 %v2452_v2 }
 0x46b   :  { %2423 = vmatprep.subr.bf16.mxu1 %v2422_v3  ;;  %2455 = vmatprep.subr.bf16.mxu0 %v2454_v4 }
 0x46e   :  { %2425 = vmatpush3.bf16.msra.mxu1 %v2424_v8  ;;  %2457 = vmatpush3.bf16.msra.mxu0 %v2456_v9 }
 0x46f   :  { %2427 = vmatprep.subr.bf16.mxu1 %v2426_v13  ;;  %2459 = vmatprep.subr.bf16.mxu0 %v2458_v19 }
 0x472   :  { %2429 = vmatpush3.bf16.msra.mxu1 %v2428_v21  ;;  %2461 = vmatpush3.bf16.msra.mxu0 %v2460_v24 }
 0x473   :  { %2462 = vmatprep.subr.bf16.mxu1 %v2528_v25 }
 0x528   :  { %v1283_v32 = vpop.f32.mrb[6].mxu1  ;;  %v1425_v36 = vpop.f32.mrb[8].mxu0 }
 0x529   :  { %v2474_v33 = vadd.f32 %v1283_v32, %v1129_v27  ;;  %v2476_v34 = vadd.f32 %v1425_v36, %v1137_v29  ;;  %v1285_v35 = vpop.f32.mrb[7].mxu1  ;;  %v1427_v38 = vpop.f32.mrb[9].mxu0 }
 0x52a   :  { %v2475_v41 = vadd.f32 %v1285_v35, %v1133_v30  ;;  %v2477_v16 = vadd.f32 %v1427_v38, %v1141_v31 }
 0x52b   :  { %v1430_v18 = vmax.f32 %v2474_v33, 0.0  ;;  %v1432_v44 = vmax.f32 %v2476_v34, 0.0 }
 0x52c   :  { %v1431_v42 = vmax.f32 %v2475_v41, 0.0  ;;  %v1433_v39 = vmax.f32 %v2477_v16, 0.0 }
 0x52e   :  { %1569 = vmatprep.mubr.f32.mxu1 %v1431_v42  ;;  %1639 = vmatprep.mubr.f32.mxu0 %v1433_v39 }
 0x52f   :  { %1570 = vmatmul.mubr.f32.vlgmr.msra.gmra.mrb[8].mxu1 %v1430_v18  ;;  %1640 = vmatmul.mubr.f32.vlgmr.msra.gmra.mrb[10].mxu0 %v1432_v44 }
 0x530   :  { %2464 = vmatpush3.bf16.msra.mxu1 %v2463_v43  ;;  %1931 = vmatprep.mubr.msk.f32.mxu1 %vm2529_vm4, %v2524_v0 }
 0x531   :  { %2465 = vmatprep.subr.bf16.mxu1 %v2528_v25 }
 0x534   :  { %2467 = vmatpush3.bf16.msra.mxu1 %v2466_v47 }
 0x535   :  { %2468 = vmatprep.subr.bf16.mxu1 %v2528_v25 }
 0x538   :  { %2470 = vmatpush3.bf16.msra.mxu1 %v2469_v50 }
 0x539   :  { %2471 = vmatprep.subr.bf16.mxu1 %v2528_v25 }
 0x53c   :  { %2473 = vmatpush3.bf16.msra.mxu1 %v2472_v53 }
 0x602   :  { %v1868_v54 = vpop.f32.mrb[8].mxu1  ;;  %v1903_v55 = vpop.f32.mrb[10].mxu0 }
 0x603   :  { %v1869_v57 = vpop.f32.mrb[9].mxu1  ;;  %v1904_v58 = vpop.f32.mrb[11].mxu0 }
 0x604   :  { %v1870_v59 = vadd.f32 %v1869_v57, %v1868_v54  ;;  %v1905_v20 = vadd.f32 %v1904_v58, %v1903_v55 }
 0x606   :  { %v1572_v60 = vadd.f32 %v1870_v59, %v1763_v56 }
 0x608   :  { %v1642_v61 = vadd.f32 %v1905_v20, %v1572_v60 }
 0x60a   :  { %v1645_v62 = vmax.f32 %v1642_v61, 0.0 }
 0x60c   :  { %1932 = vmatmul.mubr.msk.f32.vlgmr.msra.gmra.mrb[10].mxu1 %vm98_vm0, %v1645_v62 }
 0x6df   :  { %v1730_v0 = vpop.f32.mrb[10].mxu1 }
 0x6e0   :  { %v1731_v1 = vadd.f32 %v1764_v63, %v1730_v0  ;;  %v1933_v2 = vpop.f32.mrb[11].mxu1 }
 0x6e2   :  { %v1734_v3 = vsub.f32 0.0, %v1731_v1 }
 0x6e4   :  { %v1735_v4 = vmul.f32 1.442695, %v1734_v3 }
 0x6e6   :  { %2493 = vpow2.f32 %v1735_v4 }
 0x6f0   :  { %v2494_v5 = vpop.eup %2493 }
 0x6f1   :  { %v1737_v6 = vadd.f32 1.0, %v2494_v5 }
 0x6f3   :  { %2495 = vrcp.f32 %v1737_v6 }
 0x6fd   :  { %v2496_v7 = vpop.eup %2495 }
 0x6fe   :  { %1749 = vst.msk [vmem:[%s3580_s17] sm:$0x3] %vm1748_vm5, %v2496_v7 }
 0x6ff   :  { %1758 = vsyncpa [#allocation3], 1 }

</bundles_post_ra>
